<compile_context>
chip_gen: v6e
topology: v6e:2x2x1
jax: 0.10.0
libtpu: 0.0.40
codegen_flags: <defaults>
</compile_context>

<pallas_src>
import functools

import jax
import jax.numpy as jnp
from jax import lax
from jax.experimental import pallas as pl
from jax.experimental.pallas import tpu as pltpu


def _lstm_kernel(x_ref, wx_ref, wh_ref, wc_ref, woc_ref, b_ref,
                 h_out_ref, xproj_ref, *, seq_len, size_h, gate_w):
    H = size_h
    G = gate_w  # lane-aligned per-gate column block width (multiple of 128)

    # Phase 1: batched input projection, biases folded in once.
    #   (T, X) @ (X, 4G) + (1, 4G) -> (T, 4G); gate g lives in cols [g*G, g*G+H).
    xproj_ref[...] = (
        jnp.dot(x_ref[...], wx_ref[...], preferred_element_type=jnp.float32)
        + b_ref[...]
    )

    # Recurrent weights, loaded once (a handful of vregs at H=32).
    wh = wh_ref[...]     # (H, 4G)  [i | f | c | o]
    wc = wc_ref[...]     # (H, 2G)  [i | f]   (peephole on c_{t-1})
    woc = woc_ref[...]   # (H, H)   (peephole on NEW c, output gate)

    def step(t, carry):
        # cp == c1 @ wc, computed at the END of the previous step (critical-path cut).
        h1, c1, cp = carry
        xp = xproj_ref[pl.ds(t, 1), :]                                   # (1, 4G)
        pre = xp + jnp.dot(h1, wh, preferred_element_type=jnp.float32)   # (1, 4G)

        # All slices below start at 128-lane boundaries -> no XLU rotates.
        i_g = jax.nn.sigmoid(pre[:, 0:H] + cp[:, 0:H])
        f_g = jax.nn.sigmoid(pre[:, G:G + H] + cp[:, G:G + H])
        c_new = f_g * c1 + i_g * jnp.tanh(pre[:, 2 * G:2 * G + H])

        # Next step's c-peephole projection issued immediately after c_new so
        # its MXU round-trip overlaps the o-gate / tanh / multiply tail.
        cp_next = jnp.dot(c_new, wc, preferred_element_type=jnp.float32)  # (1, 2G)

        o_pre = pre[:, 3 * G:3 * G + H] + jnp.dot(
            c_new, woc, preferred_element_type=jnp.float32)
        o_g = jax.nn.sigmoid(o_pre)
        h_new = o_g * jnp.tanh(c_new)
        return h_new, c_new, cp_next

    h0 = jnp.zeros((1, H), jnp.float32)        # reset() semantics
    c0 = jnp.zeros((1, H), jnp.float32)
    cp0 = jnp.zeros((1, 2 * G), jnp.float32)   # c0 @ wc == 0
    unroll = True if seq_len <= 16 else 8
    h_final, _, _ = lax.fori_loop(0, seq_len, step, (h0, c0, cp0), unroll=unroll)

    # Single store of the final hidden state.
    h_out_ref[...] = h_final


def lstm_forward(x_seq, params):
    """x_seq: (T, size_x) float32.  Returns final hidden state, shape (size_h,)."""
    T, size_x = x_seq.shape
    size_h = params["W_ih"].shape[0]
    f32 = jnp.float32
    p = {k: jnp.asarray(v, f32) for k, v in params.items()}

    # Per-gate column block, rounded up to the 128-lane vreg width.
    G = ((size_h + 127) // 128) * 128

    def padc(w_t):   # (rows, H) -> (rows, G), zero pad extra lanes
        return jnp.pad(w_t, ((0, 0), (0, G - size_h)))

    def padb(b):     # (H,) -> (G,)
        return jnp.pad(b, (0, G - size_h))

    # Glue (plain JAX): pre-transpose, lane-align and fuse gate weights along N.
    w_x = jnp.concatenate([padc(p["W_ix"].T), padc(p["W_fx"].T),
                           padc(p["W_cx"].T), padc(p["W_ox"].T)], axis=1)   # (X, 4G)
    w_h = jnp.concatenate([padc(p["W_ih"].T), padc(p["W_fh"].T),
                           padc(p["W_ch"].T), padc(p["W_oh"].T)], axis=1)   # (H, 4G)
    w_c = jnp.concatenate([padc(p["W_ic"].T), padc(p["W_fc"].T)], axis=1)   # (H, 2G)
    w_oc = p["W_oc"].T                                                      # (H, H)
    bias = jnp.concatenate([padb(p["b_i"]), padb(p["b_f"]),
                            padb(p["b_c"]), padb(p["b_o"])])[None, :]       # (1, 4G)

    kernel = functools.partial(_lstm_kernel, seq_len=T, size_h=size_h, gate_w=G)
    vmem_spec = pl.BlockSpec(memory_space=pltpu.MemorySpace.VMEM)

    h = pl.pallas_call(
        kernel,
        out_shape=jax.ShapeDtypeStruct((1, size_h), f32),
        in_specs=[vmem_spec] * 6,
        out_specs=vmem_spec,
        scratch_shapes=[pltpu.VMEM((T, 4 * G), f32)],   # hoisted x-projection
    )(jnp.asarray(x_seq, f32), w_x, w_h, w_c, w_oc, bias)

    return h[0]  # (size_h,), matching PyTorch's returned self.h


def lstm_reference(x_seq, params):
    """Pure-JAX reference matching the PyTorch forward exactly."""
    f32 = jnp.float32
    p = {k: jnp.asarray(v, f32) for k, v in params.items()}
    size_h = p["W_ih"].shape[0]

    def step(carry, x):
        h1, c1 = carry
        i = jax.nn.sigmoid(p["W_ix"] @ x + p["W_ih"] @ h1 + p["W_ic"] @ c1 + p["b_i"])
        f = jax.nn.sigmoid(p["W_fx"] @ x + p["W_fh"] @ h1 + p["W_fc"] @ c1 + p["b_f"])
        c = f * c1 + i * jnp.tanh(p["W_cx"] @ x + p["W_ch"] @ h1 + p["b_c"])
        o = jax.nn.sigmoid(p["W_ox"] @ x + p["W_oh"] @ h1 + p["W_oc"] @ c + p["b_o"])
        h = o * jnp.tanh(c)
        return (h, c), None

    init = (jnp.zeros((size_h,), f32), jnp.zeros((size_h,), f32))
    (h, _), _ = lax.scan(step, init, jnp.asarray(x_seq, f32))
    return h


def init_params(key, size_input, size_output):
    """Deterministic stand-in for torch.normal(zeros, 0.1) init."""
    names_x = ["W_ix", "W_fx", "W_cx", "W_ox"]
    names_h = ["W_ih", "W_ic", "W_fh", "W_fc", "W_ch", "W_oh", "W_oc"]
    params = {}
    keys = jax.random.split(key, len(names_x) + len(names_h))
    k_iter = iter(keys)
    for n in names_x:
        params[n] = 0.1 * jax.random.normal(next(k_iter), (size_output, size_input),
                                            dtype=jnp.float32)
    for n in names_h:
        params[n] = 0.1 * jax.random.normal(next(k_iter), (size_output, size_output),
                                            dtype=jnp.float32)
    for n in ["b_i", "b_f", "b_c", "b_o"]:
        params[n] = jnp.zeros((size_output,), jnp.float32)
    return params


if __name__ == "__main__":
    size_input = 16   # size_x
    size_output = 32  # size_h
    seq_len = 8

    key = jax.random.PRNGKey(0)
    k_params, k_x = jax.random.split(key)
    params = init_params(k_params, size_input, size_output)
    x_seq = jax.random.normal(k_x, (seq_len, size_input), dtype=jnp.float32)

    h_kernel = jax.block_until_ready(lstm_forward(x_seq, params))
    h_ref = jax.block_until_ready(lstm_reference(x_seq, params))

    assert h_kernel.shape == (size_output,)
    assert jnp.allclose(h_kernel, h_ref, atol=1e-5, rtol=1e-5), (
        f"mismatch: max abs err = {jnp.max(jnp.abs(h_kernel - h_ref))}")

    print("KERNEL_OK")
</pallas_src>

<mosaic_0001>
module attributes {stable_mosaic.version = 11 : i64} {
  func.func @_lstm_kernel(%arg0: memref<8x16xf32, #tpu.memory_space<vmem>>, %arg1: memref<16x512xf32, #tpu.memory_space<vmem>>, %arg2: memref<32x512xf32, #tpu.memory_space<vmem>>, %arg3: memref<32x256xf32, #tpu.memory_space<vmem>>, %arg4: memref<32x32xf32, #tpu.memory_space<vmem>>, %arg5: memref<1x512xf32, #tpu.memory_space<vmem>>, %arg6: memref<1x32xf32, #tpu.memory_space<vmem>>, %arg7: memref<8x512xf32, #tpu.memory_space<vmem>>) attributes {dimension_semantics = [], scalar_prefetch = 0 : i64, scratch_operands = 1 : i64, tpu.core_type = #tpu.core_type<tc>} {
    %c0 = arith.constant 0 : index
    %c0_0 = arith.constant 0 : index
    %0 = vector.load %arg0[%c0, %c0_0] : memref<8x16xf32, #tpu.memory_space<vmem>>, vector<8x16xf32>
    %c0_1 = arith.constant 0 : index
    %c0_2 = arith.constant 0 : index
    %1 = vector.load %arg1[%c0_1, %c0_2] : memref<16x512xf32, #tpu.memory_space<vmem>>, vector<16x512xf32>
    %cst = arith.constant dense<0.000000e+00> : vector<8x512xf32>
    %2 = tpu.matmul %0, %1, %cst {dimension_numbers = #tpu.dot_dimension_numbers<[1], [0], [0], [1], [0, 0, 1, 1], [], []>} : vector<8x16xf32>, vector<16x512xf32>, vector<8x512xf32> -> vector<8x512xf32>
    %c0_3 = arith.constant 0 : index
    %c0_4 = arith.constant 0 : index
    %3 = vector.load %arg5[%c0_3, %c0_4] : memref<1x512xf32, #tpu.memory_space<vmem>>, vector<1x512xf32>
    %4 = vector.broadcast %3 : vector<1x512xf32> to vector<8x512xf32>
    %5 = arith.addf %2, %4 : vector<8x512xf32>
    %c0_5 = arith.constant 0 : index
    %c0_6 = arith.constant 0 : index
    %6 = vector.load %arg7[%c0_5, %c0_6] : memref<8x512xf32, #tpu.memory_space<vmem>>, vector<8x512xf32>
    tpu.vector_store %arg7[%c0_5, %c0_6], %5 {strides = array<i32>} : memref<8x512xf32, #tpu.memory_space<vmem>>, vector<8x512xf32>,
    %c0_7 = arith.constant 0 : index
    %c0_8 = arith.constant 0 : index
    %7 = vector.load %arg2[%c0_7, %c0_8] : memref<32x512xf32, #tpu.memory_space<vmem>>, vector<32x512xf32>
    %c0_9 = arith.constant 0 : index
    %c0_10 = arith.constant 0 : index
    %8 = vector.load %arg3[%c0_9, %c0_10] : memref<32x256xf32, #tpu.memory_space<vmem>>, vector<32x256xf32>
    %c0_11 = arith.constant 0 : index
    %c0_12 = arith.constant 0 : index
    %9 = vector.load %arg4[%c0_11, %c0_12] : memref<32x32xf32, #tpu.memory_space<vmem>>, vector<32x32xf32>
    %cst_13 = arith.constant 0.000000e+00 : f32
    %10 = vector.broadcast %cst_13 : f32 to vector<1x32xf32>
    %cst_14 = arith.constant 0.000000e+00 : f32
    %11 = vector.broadcast %cst_14 : f32 to vector<1x32xf32>
    %cst_15 = arith.constant 0.000000e+00 : f32
    %12 = vector.broadcast %cst_15 : f32 to vector<1x256xf32>
    %c0_i32 = arith.constant 0 : i32
    %13 = arith.index_cast %c0_i32 : i32 to index
    %c0_16 = arith.constant 0 : index
    %14 = vector.load %arg7[%13, %c0_16] : memref<8x512xf32, #tpu.memory_space<vmem>>, vector<1x512xf32>
    %cst_17 = arith.constant dense<0.000000e+00> : vector<1x512xf32>
    %15 = tpu.matmul %10, %7, %cst_17 {dimension_numbers = #tpu.dot_dimension_numbers<[1], [0], [0], [1], [0, 0, 1, 1], [], []>} : vector<1x32xf32>, vector<32x512xf32>, vector<1x512xf32> -> vector<1x512xf32>
    %16 = arith.addf %14, %15 : vector<1x512xf32>
    %17 = vector.extract_strided_slice %16 {offsets = [0, 0], sizes = [1, 32], strides = [1, 1]} : vector<1x512xf32> to vector<1x32xf32>
    %18 = vector.extract_strided_slice %12 {offsets = [0, 0], sizes = [1, 32], strides = [1, 1]} : vector<1x256xf32> to vector<1x32xf32>
    %19 = arith.addf %17, %18 : vector<1x32xf32>
    %20 = arith.negf %19 : vector<1x32xf32>
    %21 = math.exp %20 : vector<1x32xf32>
    %cst_18 = arith.constant 1.000000e+00 : f32
    %22 = vector.broadcast %cst_18 : f32 to vector<1x32xf32>
    %23 = arith.addf %22, %21 : vector<1x32xf32>
    %24 = arith.divf %22, %23 : vector<1x32xf32>
    %25 = vector.extract_strided_slice %16 {offsets = [0, 128], sizes = [1, 32], strides = [1, 1]} : vector<1x512xf32> to vector<1x32xf32>
    %26 = vector.extract_strided_slice %12 {offsets = [0, 128], sizes = [1, 32], strides = [1, 1]} : vector<1x256xf32> to vector<1x32xf32>
    %27 = arith.addf %25, %26 : vector<1x32xf32>
    %28 = arith.negf %27 : vector<1x32xf32>
    %29 = math.exp %28 : vector<1x32xf32>
    %cst_19 = arith.constant 1.000000e+00 : f32
    %30 = vector.broadcast %cst_19 : f32 to vector<1x32xf32>
    %31 = arith.addf %30, %29 : vector<1x32xf32>
    %32 = arith.divf %30, %31 : vector<1x32xf32>
    %33 = arith.mulf %32, %11 : vector<1x32xf32>
    %34 = vector.extract_strided_slice %16 {offsets = [0, 256], sizes = [1, 32], strides = [1, 1]} : vector<1x512xf32> to vector<1x32xf32>
    %35 = math.tanh %34 : vector<1x32xf32>
    %36 = arith.mulf %24, %35 : vector<1x32xf32>
    %37 = arith.addf %33, %36 : vector<1x32xf32>
    %cst_20 = arith.constant dense<0.000000e+00> : vector<1x256xf32>
    %38 = tpu.matmul %37, %8, %cst_20 {dimension_numbers = #tpu.dot_dimension_numbers<[1], [0], [0], [1], [0, 0, 1, 1], [], []>} : vector<1x32xf32>, vector<32x256xf32>, vector<1x256xf32> -> vector<1x256xf32>
    %39 = vector.extract_strided_slice %16 {offsets = [0, 384], sizes = [1, 32], strides = [1, 1]} : vector<1x512xf32> to vector<1x32xf32>
    %cst_21 = arith.constant dense<0.000000e+00> : vector<1x32xf32>
    %40 = tpu.matmul %37, %9, %cst_21 {dimension_numbers = #tpu.dot_dimension_numbers<[1], [0], [0], [1], [0, 0, 1, 1], [], []>} : vector<1x32xf32>, vector<32x32xf32>, vector<1x32xf32> -> vector<1x32xf32>
    %41 = arith.addf %39, %40 : vector<1x32xf32>
    %42 = arith.negf %41 : vector<1x32xf32>
    %43 = math.exp %42 : vector<1x32xf32>
    %cst_22 = arith.constant 1.000000e+00 : f32
    %44 = vector.broadcast %cst_22 : f32 to vector<1x32xf32>
    %45 = arith.addf %44, %43 : vector<1x32xf32>
    %46 = arith.divf %44, %45 : vector<1x32xf32>
    %47 = math.tanh %37 : vector<1x32xf32>
    %48 = arith.mulf %46, %47 : vector<1x32xf32>
    %c1_i32 = arith.constant 1 : i32
    %49 = arith.index_cast %c1_i32 : i32 to index
    %c0_23 = arith.constant 0 : index
    %50 = vector.load %arg7[%49, %c0_23] : memref<8x512xf32, #tpu.memory_space<vmem>>, vector<1x512xf32>
    %cst_24 = arith.constant dense<0.000000e+00> : vector<1x512xf32>
    %51 = tpu.matmul %48, %7, %cst_24 {dimension_numbers = #tpu.dot_dimension_numbers<[1], [0], [0], [1], [0, 0, 1, 1], [], []>} : vector<1x32xf32>, vector<32x512xf32>, vector<1x512xf32> -> vector<1x512xf32>
    %52 = arith.addf %50, %51 : vector<1x512xf32>
    %53 = vector.extract_strided_slice %52 {offsets = [0, 0], sizes = [1, 32], strides = [1, 1]} : vector<1x512xf32> to vector<1x32xf32>
    %54 = vector.extract_strided_slice %38 {offsets = [0, 0], sizes = [1, 32], strides = [1, 1]} : vector<1x256xf32> to vector<1x32xf32>
    %55 = arith.addf %53, %54 : vector<1x32xf32>
    %56 = arith.negf %55 : vector<1x32xf32>
    %57 = math.exp %56 : vector<1x32xf32>
    %cst_25 = arith.constant 1.000000e+00 : f32
    %58 = vector.broadcast %cst_25 : f32 to vector<1x32xf32>
    %59 = arith.addf %58, %57 : vector<1x32xf32>
    %60 = arith.divf %58, %59 : vector<1x32xf32>
    %61 = vector.extract_strided_slice %52 {offsets = [0, 128], sizes = [1, 32], strides = [1, 1]} : vector<1x512xf32> to vector<1x32xf32>
    %62 = vector.extract_strided_slice %38 {offsets = [0, 128], sizes = [1, 32], strides = [1, 1]} : vector<1x256xf32> to vector<1x32xf32>
    %63 = arith.addf %61, %62 : vector<1x32xf32>
    %64 = arith.negf %63 : vector<1x32xf32>
    %65 = math.exp %64 : vector<1x32xf32>
    %cst_26 = arith.constant 1.000000e+00 : f32
    %66 = vector.broadcast %cst_26 : f32 to vector<1x32xf32>
    %67 = arith.addf %66, %65 : vector<1x32xf32>
    %68 = arith.divf %66, %67 : vector<1x32xf32>
    %69 = arith.mulf %68, %37 : vector<1x32xf32>
    %70 = vector.extract_strided_slice %52 {offsets = [0, 256], sizes = [1, 32], strides = [1, 1]} : vector<1x512xf32> to vector<1x32xf32>
    %71 = math.tanh %70 : vector<1x32xf32>
    %72 = arith.mulf %60, %71 : vector<1x32xf32>
    %73 = arith.addf %69, %72 : vector<1x32xf32>
    %cst_27 = arith.constant dense<0.000000e+00> : vector<1x256xf32>
    %74 = tpu.matmul %73, %8, %cst_27 {dimension_numbers = #tpu.dot_dimension_numbers<[1], [0], [0], [1], [0, 0, 1, 1], [], []>} : vector<1x32xf32>, vector<32x256xf32>, vector<1x256xf32> -> vector<1x256xf32>
    %75 = vector.extract_strided_slice %52 {offsets = [0, 384], sizes = [1, 32], strides = [1, 1]} : vector<1x512xf32> to vector<1x32xf32>
    %cst_28 = arith.constant dense<0.000000e+00> : vector<1x32xf32>
    %76 = tpu.matmul %73, %9, %cst_28 {dimension_numbers = #tpu.dot_dimension_numbers<[1], [0], [0], [1], [0, 0, 1, 1], [], []>} : vector<1x32xf32>, vector<32x32xf32>, vector<1x32xf32> -> vector<1x32xf32>
    %77 = arith.addf %75, %76 : vector<1x32xf32>
    %78 = arith.negf %77 : vector<1x32xf32>
    %79 = math.exp %78 : vector<1x32xf32>
    %cst_29 = arith.constant 1.000000e+00 : f32
    %80 = vector.broadcast %cst_29 : f32 to vector<1x32xf32>
    %81 = arith.addf %80, %79 : vector<1x32xf32>
    %82 = arith.divf %80, %81 : vector<1x32xf32>
    %83 = math.tanh %73 : vector<1x32xf32>
    %84 = arith.mulf %82, %83 : vector<1x32xf32>
    %c2_i32 = arith.constant 2 : i32
    %85 = arith.index_cast %c2_i32 : i32 to index
    %c0_30 = arith.constant 0 : index
    %86 = vector.load %arg7[%85, %c0_30] : memref<8x512xf32, #tpu.memory_space<vmem>>, vector<1x512xf32>
    %cst_31 = arith.constant dense<0.000000e+00> : vector<1x512xf32>
    %87 = tpu.matmul %84, %7, %cst_31 {dimension_numbers = #tpu.dot_dimension_numbers<[1], [0], [0], [1], [0, 0, 1, 1], [], []>} : vector<1x32xf32>, vector<32x512xf32>, vector<1x512xf32> -> vector<1x512xf32>
    %88 = arith.addf %86, %87 : vector<1x512xf32>
    %89 = vector.extract_strided_slice %88 {offsets = [0, 0], sizes = [1, 32], strides = [1, 1]} : vector<1x512xf32> to vector<1x32xf32>
    %90 = vector.extract_strided_slice %74 {offsets = [0, 0], sizes = [1, 32], strides = [1, 1]} : vector<1x256xf32> to vector<1x32xf32>
    %91 = arith.addf %89, %90 : vector<1x32xf32>
    %92 = arith.negf %91 : vector<1x32xf32>
    %93 = math.exp %92 : vector<1x32xf32>
    %cst_32 = arith.constant 1.000000e+00 : f32
    %94 = vector.broadcast %cst_32 : f32 to vector<1x32xf32>
    %95 = arith.addf %94, %93 : vector<1x32xf32>
    %96 = arith.divf %94, %95 : vector<1x32xf32>
    %97 = vector.extract_strided_slice %88 {offsets = [0, 128], sizes = [1, 32], strides = [1, 1]} : vector<1x512xf32> to vector<1x32xf32>
    %98 = vector.extract_strided_slice %74 {offsets = [0, 128], sizes = [1, 32], strides = [1, 1]} : vector<1x256xf32> to vector<1x32xf32>
    %99 = arith.addf %97, %98 : vector<1x32xf32>
    %100 = arith.negf %99 : vector<1x32xf32>
    %101 = math.exp %100 : vector<1x32xf32>
    %cst_33 = arith.constant 1.000000e+00 : f32
    %102 = vector.broadcast %cst_33 : f32 to vector<1x32xf32>
    %103 = arith.addf %102, %101 : vector<1x32xf32>
    %104 = arith.divf %102, %103 : vector<1x32xf32>
    %105 = arith.mulf %104, %73 : vector<1x32xf32>
    %106 = vector.extract_strided_slice %88 {offsets = [0, 256], sizes = [1, 32], strides = [1, 1]} : vector<1x512xf32> to vector<1x32xf32>
    %107 = math.tanh %106 : vector<1x32xf32>
    %108 = arith.mulf %96, %107 : vector<1x32xf32>
    %109 = arith.addf %105, %108 : vector<1x32xf32>
    %cst_34 = arith.constant dense<0.000000e+00> : vector<1x256xf32>
    %110 = tpu.matmul %109, %8, %cst_34 {dimension_numbers = #tpu.dot_dimension_numbers<[1], [0], [0], [1], [0, 0, 1, 1], [], []>} : vector<1x32xf32>, vector<32x256xf32>, vector<1x256xf32> -> vector<1x256xf32>
    %111 = vector.extract_strided_slice %88 {offsets = [0, 384], sizes = [1, 32], strides = [1, 1]} : vector<1x512xf32> to vector<1x32xf32>
    %cst_35 = arith.constant dense<0.000000e+00> : vector<1x32xf32>
    %112 = tpu.matmul %109, %9, %cst_35 {dimension_numbers = #tpu.dot_dimension_numbers<[1], [0], [0], [1], [0, 0, 1, 1], [], []>} : vector<1x32xf32>, vector<32x32xf32>, vector<1x32xf32> -> vector<1x32xf32>
    %113 = arith.addf %111, %112 : vector<1x32xf32>
    %114 = arith.negf %113 : vector<1x32xf32>
    %115 = math.exp %114 : vector<1x32xf32>
    %cst_36 = arith.constant 1.000000e+00 : f32
    %116 = vector.broadcast %cst_36 : f32 to vector<1x32xf32>
    %117 = arith.addf %116, %115 : vector<1x32xf32>
    %118 = arith.divf %116, %117 : vector<1x32xf32>
    %119 = math.tanh %109 : vector<1x32xf32>
    %120 = arith.mulf %118, %119 : vector<1x32xf32>
    %c3_i32 = arith.constant 3 : i32
    %121 = arith.index_cast %c3_i32 : i32 to index
    %c0_37 = arith.constant 0 : index
    %122 = vector.load %arg7[%121, %c0_37] : memref<8x512xf32, #tpu.memory_space<vmem>>, vector<1x512xf32>
    %cst_38 = arith.constant dense<0.000000e+00> : vector<1x512xf32>
    %123 = tpu.matmul %120, %7, %cst_38 {dimension_numbers = #tpu.dot_dimension_numbers<[1], [0], [0], [1], [0, 0, 1, 1], [], []>} : vector<1x32xf32>, vector<32x512xf32>, vector<1x512xf32> -> vector<1x512xf32>
    %124 = arith.addf %122, %123 : vector<1x512xf32>
    %125 = vector.extract_strided_slice %124 {offsets = [0, 0], sizes = [1, 32], strides = [1, 1]} : vector<1x512xf32> to vector<1x32xf32>
    %126 = vector.extract_strided_slice %110 {offsets = [0, 0], sizes = [1, 32], strides = [1, 1]} : vector<1x256xf32> to vector<1x32xf32>
    %127 = arith.addf %125, %126 : vector<1x32xf32>
    %128 = arith.negf %127 : vector<1x32xf32>
    %129 = math.exp %128 : vector<1x32xf32>
    %cst_39 = arith.constant 1.000000e+00 : f32
    %130 = vector.broadcast %cst_39 : f32 to vector<1x32xf32>
    %131 = arith.addf %130, %129 : vector<1x32xf32>
    %132 = arith.divf %130, %131 : vector<1x32xf32>
    %133 = vector.extract_strided_slice %124 {offsets = [0, 128], sizes = [1, 32], strides = [1, 1]} : vector<1x512xf32> to vector<1x32xf32>
    %134 = vector.extract_strided_slice %110 {offsets = [0, 128], sizes = [1, 32], strides = [1, 1]} : vector<1x256xf32> to vector<1x32xf32>
    %135 = arith.addf %133, %134 : vector<1x32xf32>
    %136 = arith.negf %135 : vector<1x32xf32>
    %137 = math.exp %136 : vector<1x32xf32>
    %cst_40 = arith.constant 1.000000e+00 : f32
    %138 = vector.broadcast %cst_40 : f32 to vector<1x32xf32>
    %139 = arith.addf %138, %137 : vector<1x32xf32>
    %140 = arith.divf %138, %139 : vector<1x32xf32>
    %141 = arith.mulf %140, %109 : vector<1x32xf32>
    %142 = vector.extract_strided_slice %124 {offsets = [0, 256], sizes = [1, 32], strides = [1, 1]} : vector<1x512xf32> to vector<1x32xf32>
    %143 = math.tanh %142 : vector<1x32xf32>
    %144 = arith.mulf %132, %143 : vector<1x32xf32>
    %145 = arith.addf %141, %144 : vector<1x32xf32>
    %cst_41 = arith.constant dense<0.000000e+00> : vector<1x256xf32>
    %146 = tpu.matmul %145, %8, %cst_41 {dimension_numbers = #tpu.dot_dimension_numbers<[1], [0], [0], [1], [0, 0, 1, 1], [], []>} : vector<1x32xf32>, vector<32x256xf32>, vector<1x256xf32> -> vector<1x256xf32>
    %147 = vector.extract_strided_slice %124 {offsets = [0, 384], sizes = [1, 32], strides = [1, 1]} : vector<1x512xf32> to vector<1x32xf32>
    %cst_42 = arith.constant dense<0.000000e+00> : vector<1x32xf32>
    %148 = tpu.matmul %145, %9, %cst_42 {dimension_numbers = #tpu.dot_dimension_numbers<[1], [0], [0], [1], [0, 0, 1, 1], [], []>} : vector<1x32xf32>, vector<32x32xf32>, vector<1x32xf32> -> vector<1x32xf32>
    %149 = arith.addf %147, %148 : vector<1x32xf32>
    %150 = arith.negf %149 : vector<1x32xf32>
    %151 = math.exp %150 : vector<1x32xf32>
    %cst_43 = arith.constant 1.000000e+00 : f32
    %152 = vector.broadcast %cst_43 : f32 to vector<1x32xf32>
    %153 = arith.addf %152, %151 : vector<1x32xf32>
    %154 = arith.divf %152, %153 : vector<1x32xf32>
    %155 = math.tanh %145 : vector<1x32xf32>
    %156 = arith.mulf %154, %155 : vector<1x32xf32>
    %c4_i32 = arith.constant 4 : i32
    %157 = arith.index_cast %c4_i32 : i32 to index
    %c0_44 = arith.constant 0 : index
    %158 = vector.load %arg7[%157, %c0_44] : memref<8x512xf32, #tpu.memory_space<vmem>>, vector<1x512xf32>
    %cst_45 = arith.constant dense<0.000000e+00> : vector<1x512xf32>
    %159 = tpu.matmul %156, %7, %cst_45 {dimension_numbers = #tpu.dot_dimension_numbers<[1], [0], [0], [1], [0, 0, 1, 1], [], []>} : vector<1x32xf32>, vector<32x512xf32>, vector<1x512xf32> -> vector<1x512xf32>
    %160 = arith.addf %158, %159 : vector<1x512xf32>
    %161 = vector.extract_strided_slice %160 {offsets = [0, 0], sizes = [1, 32], strides = [1, 1]} : vector<1x512xf32> to vector<1x32xf32>
    %162 = vector.extract_strided_slice %146 {offsets = [0, 0], sizes = [1, 32], strides = [1, 1]} : vector<1x256xf32> to vector<1x32xf32>
    %163 = arith.addf %161, %162 : vector<1x32xf32>
    %164 = arith.negf %163 : vector<1x32xf32>
    %165 = math.exp %164 : vector<1x32xf32>
    %cst_46 = arith.constant 1.000000e+00 : f32
    %166 = vector.broadcast %cst_46 : f32 to vector<1x32xf32>
    %167 = arith.addf %166, %165 : vector<1x32xf32>
    %168 = arith.divf %166, %167 : vector<1x32xf32>
    %169 = vector.extract_strided_slice %160 {offsets = [0, 128], sizes = [1, 32], strides = [1, 1]} : vector<1x512xf32> to vector<1x32xf32>
    %170 = vector.extract_strided_slice %146 {offsets = [0, 128], sizes = [1, 32], strides = [1, 1]} : vector<1x256xf32> to vector<1x32xf32>
    %171 = arith.addf %169, %170 : vector<1x32xf32>
    %172 = arith.negf %171 : vector<1x32xf32>
    %173 = math.exp %172 : vector<1x32xf32>
    %cst_47 = arith.constant 1.000000e+00 : f32
    %174 = vector.broadcast %cst_47 : f32 to vector<1x32xf32>
    %175 = arith.addf %174, %173 : vector<1x32xf32>
    %176 = arith.divf %174, %175 : vector<1x32xf32>
    %177 = arith.mulf %176, %145 : vector<1x32xf32>
    %178 = vector.extract_strided_slice %160 {offsets = [0, 256], sizes = [1, 32], strides = [1, 1]} : vector<1x512xf32> to vector<1x32xf32>
    %179 = math.tanh %178 : vector<1x32xf32>
    %180 = arith.mulf %168, %179 : vector<1x32xf32>
    %181 = arith.addf %177, %180 : vector<1x32xf32>
    %cst_48 = arith.constant dense<0.000000e+00> : vector<1x256xf32>
    %182 = tpu.matmul %181, %8, %cst_48 {dimension_numbers = #tpu.dot_dimension_numbers<[1], [0], [0], [1], [0, 0, 1, 1], [], []>} : vector<1x32xf32>, vector<32x256xf32>, vector<1x256xf32> -> vector<1x256xf32>
    %183 = vector.extract_strided_slice %160 {offsets = [0, 384], sizes = [1, 32], strides = [1, 1]} : vector<1x512xf32> to vector<1x32xf32>
    %cst_49 = arith.constant dense<0.000000e+00> : vector<1x32xf32>
    %184 = tpu.matmul %181, %9, %cst_49 {dimension_numbers = #tpu.dot_dimension_numbers<[1], [0], [0], [1], [0, 0, 1, 1], [], []>} : vector<1x32xf32>, vector<32x32xf32>, vector<1x32xf32> -> vector<1x32xf32>
    %185 = arith.addf %183, %184 : vector<1x32xf32>
    %186 = arith.negf %185 : vector<1x32xf32>
    %187 = math.exp %186 : vector<1x32xf32>
    %cst_50 = arith.constant 1.000000e+00 : f32
    %188 = vector.broadcast %cst_50 : f32 to vector<1x32xf32>
    %189 = arith.addf %188, %187 : vector<1x32xf32>
    %190 = arith.divf %188, %189 : vector<1x32xf32>
    %191 = math.tanh %181 : vector<1x32xf32>
    %192 = arith.mulf %190, %191 : vector<1x32xf32>
    %c5_i32 = arith.constant 5 : i32
    %193 = arith.index_cast %c5_i32 : i32 to index
    %c0_51 = arith.constant 0 : index
    %194 = vector.load %arg7[%193, %c0_51] : memref<8x512xf32, #tpu.memory_space<vmem>>, vector<1x512xf32>
    %cst_52 = arith.constant dense<0.000000e+00> : vector<1x512xf32>
    %195 = tpu.matmul %192, %7, %cst_52 {dimension_numbers = #tpu.dot_dimension_numbers<[1], [0], [0], [1], [0, 0, 1, 1], [], []>} : vector<1x32xf32>, vector<32x512xf32>, vector<1x512xf32> -> vector<1x512xf32>
    %196 = arith.addf %194, %195 : vector<1x512xf32>
    %197 = vector.extract_strided_slice %196 {offsets = [0, 0], sizes = [1, 32], strides = [1, 1]} : vector<1x512xf32> to vector<1x32xf32>
    %198 = vector.extract_strided_slice %182 {offsets = [0, 0], sizes = [1, 32], strides = [1, 1]} : vector<1x256xf32> to vector<1x32xf32>
    %199 = arith.addf %197, %198 : vector<1x32xf32>
    %200 = arith.negf %199 : vector<1x32xf32>
    %201 = math.exp %200 : vector<1x32xf32>
    %cst_53 = arith.constant 1.000000e+00 : f32
    %202 = vector.broadcast %cst_53 : f32 to vector<1x32xf32>
    %203 = arith.addf %202, %201 : vector<1x32xf32>
    %204 = arith.divf %202, %203 : vector<1x32xf32>
    %205 = vector.extract_strided_slice %196 {offsets = [0, 128], sizes = [1, 32], strides = [1, 1]} : vector<1x512xf32> to vector<1x32xf32>
    %206 = vector.extract_strided_slice %182 {offsets = [0, 128], sizes = [1, 32], strides = [1, 1]} : vector<1x256xf32> to vector<1x32xf32>
    %207 = arith.addf %205, %206 : vector<1x32xf32>
    %208 = arith.negf %207 : vector<1x32xf32>
    %209 = math.exp %208 : vector<1x32xf32>
    %cst_54 = arith.constant 1.000000e+00 : f32
    %210 = vector.broadcast %cst_54 : f32 to vector<1x32xf32>
    %211 = arith.addf %210, %209 : vector<1x32xf32>
    %212 = arith.divf %210, %211 : vector<1x32xf32>
    %213 = arith.mulf %212, %181 : vector<1x32xf32>
    %214 = vector.extract_strided_slice %196 {offsets = [0, 256], sizes = [1, 32], strides = [1, 1]} : vector<1x512xf32> to vector<1x32xf32>
    %215 = math.tanh %214 : vector<1x32xf32>
    %216 = arith.mulf %204, %215 : vector<1x32xf32>
    %217 = arith.addf %213, %216 : vector<1x32xf32>
    %cst_55 = arith.constant dense<0.000000e+00> : vector<1x256xf32>
    %218 = tpu.matmul %217, %8, %cst_55 {dimension_numbers = #tpu.dot_dimension_numbers<[1], [0], [0], [1], [0, 0, 1, 1], [], []>} : vector<1x32xf32>, vector<32x256xf32>, vector<1x256xf32> -> vector<1x256xf32>
    %219 = vector.extract_strided_slice %196 {offsets = [0, 384], sizes = [1, 32], strides = [1, 1]} : vector<1x512xf32> to vector<1x32xf32>
    %cst_56 = arith.constant dense<0.000000e+00> : vector<1x32xf32>
    %220 = tpu.matmul %217, %9, %cst_56 {dimension_numbers = #tpu.dot_dimension_numbers<[1], [0], [0], [1], [0, 0, 1, 1], [], []>} : vector<1x32xf32>, vector<32x32xf32>, vector<1x32xf32> -> vector<1x32xf32>
    %221 = arith.addf %219, %220 : vector<1x32xf32>
    %222 = arith.negf %221 : vector<1x32xf32>
    %223 = math.exp %222 : vector<1x32xf32>
    %cst_57 = arith.constant 1.000000e+00 : f32
    %224 = vector.broadcast %cst_57 : f32 to vector<1x32xf32>
    %225 = arith.addf %224, %223 : vector<1x32xf32>
    %226 = arith.divf %224, %225 : vector<1x32xf32>
    %227 = math.tanh %217 : vector<1x32xf32>
    %228 = arith.mulf %226, %227 : vector<1x32xf32>
    %c6_i32 = arith.constant 6 : i32
    %229 = arith.index_cast %c6_i32 : i32 to index
    %c0_58 = arith.constant 0 : index
    %230 = vector.load %arg7[%229, %c0_58] : memref<8x512xf32, #tpu.memory_space<vmem>>, vector<1x512xf32>
    %cst_59 = arith.constant dense<0.000000e+00> : vector<1x512xf32>
    %231 = tpu.matmul %228, %7, %cst_59 {dimension_numbers = #tpu.dot_dimension_numbers<[1], [0], [0], [1], [0, 0, 1, 1], [], []>} : vector<1x32xf32>, vector<32x512xf32>, vector<1x512xf32> -> vector<1x512xf32>
    %232 = arith.addf %230, %231 : vector<1x512xf32>
    %233 = vector.extract_strided_slice %232 {offsets = [0, 0], sizes = [1, 32], strides = [1, 1]} : vector<1x512xf32> to vector<1x32xf32>
    %234 = vector.extract_strided_slice %218 {offsets = [0, 0], sizes = [1, 32], strides = [1, 1]} : vector<1x256xf32> to vector<1x32xf32>
    %235 = arith.addf %233, %234 : vector<1x32xf32>
    %236 = arith.negf %235 : vector<1x32xf32>
    %237 = math.exp %236 : vector<1x32xf32>
    %cst_60 = arith.constant 1.000000e+00 : f32
    %238 = vector.broadcast %cst_60 : f32 to vector<1x32xf32>
    %239 = arith.addf %238, %237 : vector<1x32xf32>
    %240 = arith.divf %238, %239 : vector<1x32xf32>
    %241 = vector.extract_strided_slice %232 {offsets = [0, 128], sizes = [1, 32], strides = [1, 1]} : vector<1x512xf32> to vector<1x32xf32>
    %242 = vector.extract_strided_slice %218 {offsets = [0, 128], sizes = [1, 32], strides = [1, 1]} : vector<1x256xf32> to vector<1x32xf32>
    %243 = arith.addf %241, %242 : vector<1x32xf32>
    %244 = arith.negf %243 : vector<1x32xf32>
    %245 = math.exp %244 : vector<1x32xf32>
    %cst_61 = arith.constant 1.000000e+00 : f32
    %246 = vector.broadcast %cst_61 : f32 to vector<1x32xf32>
    %247 = arith.addf %246, %245 : vector<1x32xf32>
    %248 = arith.divf %246, %247 : vector<1x32xf32>
    %249 = arith.mulf %248, %217 : vector<1x32xf32>
    %250 = vector.extract_strided_slice %232 {offsets = [0, 256], sizes = [1, 32], strides = [1, 1]} : vector<1x512xf32> to vector<1x32xf32>
    %251 = math.tanh %250 : vector<1x32xf32>
    %252 = arith.mulf %240, %251 : vector<1x32xf32>
    %253 = arith.addf %249, %252 : vector<1x32xf32>
    %cst_62 = arith.constant dense<0.000000e+00> : vector<1x256xf32>
    %254 = tpu.matmul %253, %8, %cst_62 {dimension_numbers = #tpu.dot_dimension_numbers<[1], [0], [0], [1], [0, 0, 1, 1], [], []>} : vector<1x32xf32>, vector<32x256xf32>, vector<1x256xf32> -> vector<1x256xf32>
    %255 = vector.extract_strided_slice %232 {offsets = [0, 384], sizes = [1, 32], strides = [1, 1]} : vector<1x512xf32> to vector<1x32xf32>
    %cst_63 = arith.constant dense<0.000000e+00> : vector<1x32xf32>
    %256 = tpu.matmul %253, %9, %cst_63 {dimension_numbers = #tpu.dot_dimension_numbers<[1], [0], [0], [1], [0, 0, 1, 1], [], []>} : vector<1x32xf32>, vector<32x32xf32>, vector<1x32xf32> -> vector<1x32xf32>
    %257 = arith.addf %255, %256 : vector<1x32xf32>
    %258 = arith.negf %257 : vector<1x32xf32>
    %259 = math.exp %258 : vector<1x32xf32>
    %cst_64 = arith.constant 1.000000e+00 : f32
    %260 = vector.broadcast %cst_64 : f32 to vector<1x32xf32>
    %261 = arith.addf %260, %259 : vector<1x32xf32>
    %262 = arith.divf %260, %261 : vector<1x32xf32>
    %263 = math.tanh %253 : vector<1x32xf32>
    %264 = arith.mulf %262, %263 : vector<1x32xf32>
    %c7_i32 = arith.constant 7 : i32
    %265 = arith.index_cast %c7_i32 : i32 to index
    %c0_65 = arith.constant 0 : index
    %266 = vector.load %arg7[%265, %c0_65] : memref<8x512xf32, #tpu.memory_space<vmem>>, vector<1x512xf32>
    %cst_66 = arith.constant dense<0.000000e+00> : vector<1x512xf32>
    %267 = tpu.matmul %264, %7, %cst_66 {dimension_numbers = #tpu.dot_dimension_numbers<[1], [0], [0], [1], [0, 0, 1, 1], [], []>} : vector<1x32xf32>, vector<32x512xf32>, vector<1x512xf32> -> vector<1x512xf32>
    %268 = arith.addf %266, %267 : vector<1x512xf32>
    %269 = vector.extract_strided_slice %268 {offsets = [0, 0], sizes = [1, 32], strides = [1, 1]} : vector<1x512xf32> to vector<1x32xf32>
    %270 = vector.extract_strided_slice %254 {offsets = [0, 0], sizes = [1, 32], strides = [1, 1]} : vector<1x256xf32> to vector<1x32xf32>
    %271 = arith.addf %269, %270 : vector<1x32xf32>
    %272 = arith.negf %271 : vector<1x32xf32>
    %273 = math.exp %272 : vector<1x32xf32>
    %cst_67 = arith.constant 1.000000e+00 : f32
    %274 = vector.broadcast %cst_67 : f32 to vector<1x32xf32>
    %275 = arith.addf %274, %273 : vector<1x32xf32>
    %276 = arith.divf %274, %275 : vector<1x32xf32>
    %277 = vector.extract_strided_slice %268 {offsets = [0, 128], sizes = [1, 32], strides = [1, 1]} : vector<1x512xf32> to vector<1x32xf32>
    %278 = vector.extract_strided_slice %254 {offsets = [0, 128], sizes = [1, 32], strides = [1, 1]} : vector<1x256xf32> to vector<1x32xf32>
    %279 = arith.addf %277, %278 : vector<1x32xf32>
    %280 = arith.negf %279 : vector<1x32xf32>
    %281 = math.exp %280 : vector<1x32xf32>
    %cst_68 = arith.constant 1.000000e+00 : f32
    %282 = vector.broadcast %cst_68 : f32 to vector<1x32xf32>
    %283 = arith.addf %282, %281 : vector<1x32xf32>
    %284 = arith.divf %282, %283 : vector<1x32xf32>
    %285 = arith.mulf %284, %253 : vector<1x32xf32>
    %286 = vector.extract_strided_slice %268 {offsets = [0, 256], sizes = [1, 32], strides = [1, 1]} : vector<1x512xf32> to vector<1x32xf32>
    %287 = math.tanh %286 : vector<1x32xf32>
    %288 = arith.mulf %276, %287 : vector<1x32xf32>
    %289 = arith.addf %285, %288 : vector<1x32xf32>
    %cst_69 = arith.constant dense<0.000000e+00> : vector<1x256xf32>
    %290 = tpu.matmul %289, %8, %cst_69 {dimension_numbers = #tpu.dot_dimension_numbers<[1], [0], [0], [1], [0, 0, 1, 1], [], []>} : vector<1x32xf32>, vector<32x256xf32>, vector<1x256xf32> -> vector<1x256xf32>
    %291 = vector.extract_strided_slice %268 {offsets = [0, 384], sizes = [1, 32], strides = [1, 1]} : vector<1x512xf32> to vector<1x32xf32>
    %cst_70 = arith.constant dense<0.000000e+00> : vector<1x32xf32>
    %292 = tpu.matmul %289, %9, %cst_70 {dimension_numbers = #tpu.dot_dimension_numbers<[1], [0], [0], [1], [0, 0, 1, 1], [], []>} : vector<1x32xf32>, vector<32x32xf32>, vector<1x32xf32> -> vector<1x32xf32>
    %293 = arith.addf %291, %292 : vector<1x32xf32>
    %294 = arith.negf %293 : vector<1x32xf32>
    %295 = math.exp %294 : vector<1x32xf32>
    %cst_71 = arith.constant 1.000000e+00 : f32
    %296 = vector.broadcast %cst_71 : f32 to vector<1x32xf32>
    %297 = arith.addf %296, %295 : vector<1x32xf32>
    %298 = arith.divf %296, %297 : vector<1x32xf32>
    %299 = math.tanh %289 : vector<1x32xf32>
    %300 = arith.mulf %298, %299 : vector<1x32xf32>
    %c8_i32 = arith.constant 8 : i32
    %c0_72 = arith.constant 0 : index
    %c0_73 = arith.constant 0 : index
    %301 = vector.load %arg6[%c0_72, %c0_73] : memref<1x32xf32, #tpu.memory_space<vmem>>, vector<1x32xf32>
    tpu.vector_store %arg6[%c0_72, %c0_73], %300 {strides = array<i32>} : memref<1x32xf32, #tpu.memory_space<vmem>>, vector<1x32xf32>,
    return
  }
}

</mosaic_0001>

<bundles_post_ra>
// kernel: tpu_custom_call.1
= control target key start
LH: loop header
LB: loop body
LE: loop exit
PB: predicated region body
PF: predicated region fallthrough
CT: control target
= control target key end

     0   :  { %11 = vsyncpa [#allocation4], 0  ;;  %s4124_s0 = inlined_call_operand.hbm [shape: f32[8,16], index: 0, kind: input, shape index: {}]   ;;  %s4125_s1 = inlined_call_operand.hbm [shape: f32[16,512], index: 1, kind: input, shape index: {}]   ;;  %s4126_s2 = inlined_call_operand.hbm [shape: f32[32,512], index: 2, kind: input, shape index: {}]   ;;  %s4127_s3 = inlined_call_operand.hbm [shape: f32[32,256], index: 3, kind: input, shape index: {}]   ;;  %s4128_s4 = inlined_call_operand.hbm [shape: f32[32,32], index: 4, kind: input, shape index: {}]   ;;  %s4129_s5 = inlined_call_operand.vmem [shape: f32[1,512], index: 5, kind: input, shape index: {}]   ;;  %s4130_s6 = inlined_call_operand.hbm [shape: f32[1,32], index: 6, kind: output, shape index: {}]  }
   0x1   :  { %12 = vsyncpa [#allocation7], 0 }
   0x2   :  { %13 = vsyncpa [#allocation10], 0 }
   0x3   :  { %14 = vsyncpa [#allocation5], 0  ;;  %s3569_s21 = smov [#allocation6]  }
   0x4   :  { %s30_s22 = sshll.u32 %s3569_s21, 4  ;;  %s31_s22 = int_to_ptr.vmem [resolvable:$true] %s30_s22 }
   0x5   :  { %s3449_s23 = scalar_lea.vmem %s31_s22, 1024  ;;  %p3454_p1 = scmp.lt.s32.totalorder %s31_s22, %s31_s22 }
   0x6   :  { %p3450_p0 = scmp.ne.s32.totalorder %s31_s22, %s3449_s23  ;;  %p3455_p2 = scmp.lt.s32.totalorder %s3449_s23, %s3449_s23 }
   0x8   :  { %p3456_p3 = por %p3455_p2, %p3454_p1 }
   0xa   :  { %p3457_p4 = pnand %p3456_p3, %p3450_p0 }
   0xc   :  { %3460 = shalt.err (!%p3457_p4)
}
   0xd   :  { %s3570_s24 = smov 512   ;;  %s3571_s25 = smov 32  }
   0xe   :  { %36 = dma.hbm_to_vmem [thread:$0]  %s4125_s1, 1024, %s31_s22, [#allocation7], %s3570_s24, %s3570_s24, %s3571_s25  }
   0xf   :  { %s3572_s28 = smov [#allocation9]  }
  0x10   :  { %s54_s29 = sshll.u32 %s3572_s28, 4  ;;  %s55_s29 = int_to_ptr.vmem [resolvable:$true] %s54_s29 }
  0x11   :  { %s3469_s30 = scalar_lea.vmem %s55_s29, 1024  ;;  %p3474_p6 = scmp.lt.s32.totalorder %s55_s29, %s55_s29 }
  0x12   :  { %p3470_p5 = scmp.ne.s32.totalorder %s55_s29, %s3469_s30  ;;  %p3475_p7 = scmp.lt.s32.totalorder %s3469_s30, %s3469_s30 }
  0x14   :  { %p3476_p8 = por %p3475_p7, %p3474_p6 }
  0x16   :  { %p3477_p9 = pnand %p3476_p8, %p3470_p5 }
  0x18   :  { %3480 = shalt.err (!%p3477_p9)
}
  0x19   :  { %s3573_s7 = smov 256   ;;  %s3574_s8 = smov 16  }
  0x1a   :  { %60 = dma.hbm_to_vmem [thread:$0]  %s4127_s3, 1024, %s55_s29, [#allocation10], %s3573_s7, %s3573_s7, %s3574_s8  }
  0x1b   :  { %s3575_s11 = smov [#allocation3]   ;;  %s3576_s13 = smov [#allocation8]  }
  0x1c   :  { %s21_s12 = sshll.u32 %s3575_s11, 4  ;;  %s42_s1 = sshll.u32 %s3576_s13, 4  ;;  %s22_s12 = int_to_ptr.vmem [resolvable:$true] %s21_s12  ;;  %s43_s1 = int_to_ptr.vmem [resolvable:$true] %s42_s1 }
  0x1d   :  { %s3489_s14 = scalar_lea.vmem %s22_s12, 128  ;;  %p3494_p11 = scmp.lt.s32.totalorder %s22_s12, %s22_s12 }
  0x1e   :  { %p3490_p10 = scmp.ne.s32.totalorder %s22_s12, %s3489_s14  ;;  %p3495_p12 = scmp.lt.s32.totalorder %s3489_s14, %s3489_s14 }
  0x20   :  { %p3496_p13 = por %p3495_p12, %p3494_p11 }
  0x22   :  { %p3497_p0 = pnand %p3496_p13, %p3490_p10 }
  0x24   :  { %3500 = shalt.err (!%p3497_p0)
}
  0x25   :  { %24 = dma.hbm_to_vmem [thread:$0]  %s4124_s0, 128, %s22_s12, [#allocation4]  }
  0x26   :  { %s3509_s17 = scalar_lea.vmem %s43_s1, 2048  ;;  %p3514_p2 = scmp.lt.s32.totalorder %s43_s1, %s43_s1 }
  0x27   :  { %p3510_p1 = scmp.ne.s32.totalorder %s43_s1, %s3509_s17  ;;  %p3515_p3 = scmp.lt.s32.totalorder %s3509_s17, %s3509_s17 }
  0x29   :  { %p3516_p4 = por %p3515_p3, %p3514_p2 }
  0x2b   :  { %p3517_p5 = pnand %p3516_p4, %p3510_p1 }
  0x2d   :  { %3520 = shalt.err (!%p3517_p5)
}
  0x2e   :  { %48 = dma.hbm_to_vmem [thread:$0]  %s4126_s2, 2048, %s43_s1, [#allocation7], %s3570_s24, %s3570_s24, %s3571_s25  }
  0x2f   :  { %s3577_s19 = smov [#allocation11]  }
  0x30   :  { %s66_s20 = sshll.u32 %s3577_s19, 4  ;;  %s67_s20 = int_to_ptr.vmem [resolvable:$true] %s66_s20 }
  0x31   :  { %s3529_s21 = scalar_lea.vmem %s67_s20, 512  ;;  %p3534_p7 = scmp.lt.s32.totalorder %s67_s20, %s67_s20 }
  0x32   :  { %p3530_p6 = scmp.ne.s32.totalorder %s67_s20, %s3529_s21  ;;  %p3535_p8 = scmp.lt.s32.totalorder %s3529_s21, %s3529_s21 }
  0x34   :  { %p3536_p9 = por %p3535_p8, %p3534_p7 }
  0x36   :  { %p3537_p10 = pnand %p3536_p9, %p3530_p6 }
  0x38   :  { %3540 = shalt.err (!%p3537_p10)
}
  0x39   :  { %s3578_s0 = smov 128   ;;  %s3579_s22 = smov 8  }
  0x3a   :  { %72 = dma.hbm_to_vmem [thread:$0]  %s4128_s4, 512, %s67_s20, [#allocation10], %s3578_s0, %s3578_s0, %s3579_s22  }
  0x3b   :  { %3561 = dma.done.wait [#allocation4], 128  }
  0x3c   :  { %3562 = vsyncadd [#allocation4], 4294967168 }
  0x3d   :  { %3563 = dma.done.wait [#allocation7], 3072  }
  0x3e   :  { %3564 = vsyncadd [#allocation7], 4294964224 }
  0x3f   :  { %3565 = dma.done.wait [#allocation10], 1536  }
  0x40   :  { %3566 = vsyncadd [#allocation10], 4294965760  ;;  %v3580_v0 = vmov 0.0   ;;  %v96_v1 = vld [vmem:[#allocation6 + $0x28] sm:$0xff]  ;;  %v95_v2 = vld [vmem:[#allocation6 + $0x20] sm:$0xff]  ;;  %vm121_vm0 = vcmask 130048   ;;  %v101_v38 = vlaneseq }
  0x41   :  { %189 = vmatprep.mubr.f32.mxu1 %v3580_v0  ;;  %368 = vmatprep.mubr.f32.mxu0 %v3580_v0  ;;  %v92_v3 = vld [vmem:[#allocation6 + $0x8] sm:$0xff]  ;;  %v91_v4 = vld [vmem:[#allocation6] sm:$0xff]  ;;  %v90_v5 = vld [vmem:[#allocation3] sm:$0xff]  ;;  %vm3581_vm1 = vmmov 0   ;;  %v3582_v54 = vmov 1966171168  }
  0x42   :  { %153 = vmatprep.subr.mxu1 %v96_v1  ;;  %v98_v6 = vld [vmem:[#allocation6 + $0x38] sm:$0xff]  ;;  %v3642_v7 = vld [vmem:[#allocation8 + $0x68] sm:$0xff]  ;;  %v97_v8 = vld [vmem:[#allocation6 + $0x30] sm:$0xff]  ;;  %v102_v39 = vshrl.u32 %v101_v38, 7  ;;  %v453_v55 = vunpack.c.l.s4 %v3582_v54  ;;  %vm300_vm2 = vcmask 261120   ;;  %vm3068_vm3 = vcmask 253952  }
  0x43   :  { %154 = vmatpush1.msra.mxu1 %v95_v2  ;;  %328 = vmatprep.subr.mxu0 %v3642_v7  ;;  %v3645_v9 = vld [vmem:[#allocation8 + $0x60] sm:$0xff]  ;;  %v94_v10 = vld [vmem:[#allocation6 + $0x18] sm:$0xff]  ;;  %v3648_v11 = vld [vmem:[#allocation8 + $0x48] sm:$0xff] }
  0x44   :  { %155 = vmatprep.subr.mxu1 %v92_v3  ;;  %329 = vmatpush1.msra.mxu0 %v3645_v9  ;;  %v93_v12 = vld [vmem:[#allocation6 + $0x10] sm:$0xff]  ;;  %v3651_v13 = vld [vmem:[#allocation8 + $0x40] sm:$0xff]  ;;  %v3654_v14 = vld [vmem:[#allocation8 + $0x78] sm:$0xff]  ;;  %v103_v40 = vsub.s32 0, %v102_v39  ;;  %v107_v42 = vsub.s32 1, %v102_v39  ;;  %v111_v44 = vsub.s32 2, %v102_v39  ;;  %v454_v59 = vunpack.c.0.s8 %v453_v55 }
  0x45   :  { %156 = vmatpush1.msra.mxu1 %v91_v4  ;;  %330 = vmatprep.subr.mxu0 %v3648_v11  ;;  %v3657_v15 = vld [vmem:[#allocation8 + $0x70] sm:$0xff]  ;;  %v3659_v16 = vld [vmem:[#allocation8 + $0x28] sm:$0xff]  ;;  %v3662_v17 = vld [vmem:[#allocation8 + $0x58] sm:$0xff]  ;;  %v115_v46 = vsub.s32 3, %v102_v39 }
  0x46   :  { %3087 = vmatmul.mubr.msk.f32.vlgmr.msra.gmra.mxu1 %vm121_vm0, %v90_v5  ;;  %224 = vmatprep.subr.mxu1 %v98_v6  ;;  %v3664_v18 = vld [vmem:[#allocation8 + $0x20] sm:$0xff]  ;;  %v3668_v19 = vld [vmem:[#allocation8 + $0x50] sm:$0xff]  ;;  %v3670_v20 = vld [vmem:[#allocation8 + $0x8] sm:$0xff]  ;;  %v3744_v63 = vsub.s32 %v454_v59, %v102_v39 }
  0x47   :  { %225 = vmatpush1.msra.mxu1 %v97_v8  ;;  %260 = vmatprep.mubr.f32.mxu1 %v3580_v0  ;;  %v3674_v21 = vld [vmem:[#allocation8 + $0x38] sm:$0xff]  ;;  %v3676_v22 = vld [vmem:[#allocation8] sm:$0xff]  ;;  %v3680_v23 = vld [vmem:[#allocation8 + $0x30] sm:$0xff] }
  0x48   :  { %226 = vmatprep.subr.mxu1 %v94_v10  ;;  %331 = vmatpush1.msra.mxu0 %v3651_v13  ;;  %v3684_v24 = vld [vmem:[#allocation8 + $0x18] sm:$0xff]  ;;  %v3688_v25 = vld [vmem:[#allocation8 + $0x10] sm:$0xff]  ;;  %v3706_v29 = vld [vmem:[#allocation9 + $0x28] sm:$0xff] }
  0x49   :  { %227 = vmatpush1.msra.mxu1 %v93_v12  ;;  %332 = vmatprep.subr.mxu0 %v3659_v16  ;;  %v3698_v26 = vld [vmem:[#allocation9 + $0x38] sm:$0xff]  ;;  %v3700_v27 = vld [vmem:[#allocation9 + $0x30] sm:$0xff]  ;;  %v3708_v30 = vld [vmem:[#allocation9 + $0x20] sm:$0xff] }
  0x4a   :  { %3088 = vmatmul.mubr.msk.f32.vlgmr.msra.gmra.mxu1 %vm121_vm0, %v90_v5  ;;  %399 = vmatprep.subr.mxu1 %v3654_v14  ;;  %v3702_v28 = vld [vmem:[#allocation11 + $0x18] sm:$0xff]  ;;  %v3710_v31 = vld [vmem:[#allocation11 + $0x10] sm:$0xff]  ;;  %v3716_v33 = vld [vmem:[#allocation11 + $0x8] sm:$0xff] }
  0x4b   :  { %400 = vmatpush1.msra.mxu1 %v3657_v15  ;;  %333 = vmatpush1.msra.mxu0 %v3664_v18  ;;  %v3714_v32 = vld [vmem:[#allocation9 + $0x18] sm:$0xff]  ;;  %v3720_v34 = vld [vmem:[#allocation9 + $0x10] sm:$0xff]  ;;  %v3724_v35 = vld [vmem:[#allocation9 + $0x8] sm:$0xff] }
  0x4c   :  { %401 = vmatprep.subr.mxu1 %v3662_v17  ;;  %334 = vmatprep.subr.mxu0 %v3670_v20  ;;  %v3726_v36 = vld [vmem:[#allocation11] sm:$0xff]  ;;  %v99_v41 = vld [vmem:[%s4129_s5] sm:$0xf]  ;;  %s3583_s5 = smov [#allocation12]  }
  0x4d   :  { %402 = vmatpush1.msra.mxu1 %v3668_v19  ;;  %335 = vmatpush1.msra.mxu0 %v3676_v22  ;;  %v3730_v37 = vld [vmem:[#allocation9] sm:$0xff]  ;;  %v104_v43 = vrot.slane %v99_v41, %v103_v40  ;;  %v108_v45 = vrot.slane %v99_v41, %v107_v42  ;;  %v112_v49 = vrot.slane %v99_v41, %v111_v44  ;;  %s3076_s24 = sshll.u32 %s3583_s5, 4  ;;  %s3077_s24 = int_to_ptr.vmem [resolvable:$true] %s3076_s24 }
  0x4e   :  { %403 = vmatprep.subr.mxu1 %v3674_v21  ;;  %369 = vmatmul.mubr.f32.vlgmr.msra.gmra.mxu0 %v3580_v0  ;;  %v116_v52 = vrot.slane %v99_v41, %v115_v46  ;;  %s3541_s25 = scalar_lea.vmem %s3077_s24, 16  ;;  %s3545_s27 = scalar_lea.vmem %s3077_s24, 32 }
  0x4f   :  { %404 = vmatpush1.msra.mxu1 %v3680_v23  ;;  %439 = vmatprep.mubr.f32.mxu1 %v3580_v0  ;;  %p3542_p11 = scmp.ne.s32.totalorder %s3077_s24, %s3541_s25  ;;  %p3546_p12 = scmp.lt.s32.totalorder %s3077_s24, %s3077_s24 }
  0x50   :  { %405 = vmatprep.subr.mxu1 %v3684_v24  ;;  %566 = vmatprep.mubr.f32.mxu0 %v3580_v0  ;;  %p3547_p13 = scmp.lt.s32.totalorder %s3545_s27, %s3541_s25 }
  0x51   :  { %406 = vmatpush1.msra.mxu1 %v3688_v25  ;;  %526 = vmatprep.subr.mxu0 %v3698_v26 }
  0x52   :  { %440 = vmatmul.mubr.f32.vlgmr.msra.gmra.mxu1 %v3580_v0  ;;  %3182 = vmatprep.subr.mxu1 %v3580_v0  ;;  %p3548_p0 = por %p3547_p13, %p3546_p12 }
  0x53   :  { %3183 = vmatpush3.msra.mxu1 %v3702_v28  ;;  %527 = vmatpush1.msra.mxu0 %v3700_v27 }
  0x54   :  { %3184 = vmatprep.subr.mxu1 %v3580_v0  ;;  %528 = vmatprep.subr.mxu0 %v3706_v29  ;;  %p3549_p1 = pnand %p3548_p0, %p3542_p11 }
  0x55   :  { %3185 = vmatpush3.msra.mxu1 %v3710_v31  ;;  %529 = vmatpush1.msra.mxu0 %v3708_v30 }
  0x56   :  { %3186 = vmatprep.subr.mxu1 %v3580_v0  ;;  %530 = vmatprep.subr.mxu0 %v3714_v32 }
  0x57   :  { %3187 = vmatpush3.msra.mxu1 %v3716_v33  ;;  %531 = vmatpush1.msra.mxu0 %v3720_v34 }
  0x58   :  { %3188 = vmatprep.subr.mxu1 %v3580_v0  ;;  %532 = vmatprep.subr.mxu0 %v3724_v35 }
  0x59   :  { %3189 = vmatpush3.msra.mxu1 %v3726_v36  ;;  %533 = vmatpush1.msra.mxu0 %v3730_v37 }
  0x5a   :  { %3190 = vmatprep.mubr.msk.f32.mxu1 %vm3581_vm1, %v3580_v0  ;;  %683 = vmatprep.subr.mxu0 %v3642_v7 }
  0x5b   :  { %754 = vmatprep.subr.mxu1 %v3654_v14 }
 0x106   :  { %v191_v47 = vpop.f32.mrf.mxu1 }
 0x107   :  { %v192_v48 = vadd.f32 %v191_v47, %v104_v43 }
 0x108   :  { %v193_v50 = vpop.f32.mrf.mxu1 }
 0x109   :  { %267 = vst [vmem:[#allocation2] sm:$0xff] %v192_v48  ;;  %v194_v51 = vadd.f32 %v193_v50, %v108_v45 }
 0x10a   :  { %v262_v53 = vpop.f32.mrf.mxu1 }
 0x10b   :  { %268 = vst [vmem:[#allocation2 + $0x8] sm:$0xff] %v194_v51  ;;  %v263_v56 = vadd.f32 %v262_v53, %v112_v49 }
 0x10c   :  { %v264_v57 = vpop.f32.mrf.mxu1 }
 0x10d   :  { %269 = vst [vmem:[#allocation2 + $0x10] sm:$0xff] %v263_v56  ;;  %v265_v58 = vadd.f32 %v264_v57, %v116_v52 }
 0x10e   :  { %v370_v60 = vpop.f32.mrf.mxu0 }
 0x10f   :  { %270 = vst [vmem:[#allocation2 + $0x18] sm:$0xff] %v265_v58 }
 0x110   :  { %v372_v61 = vpop.f32.mrf.mxu0 }
 0x111   :  { %v450_v1 = vcombine.low %v370_v60, %v372_v61 }
 0x112   :  { %v441_v62 = vpop.f32.mrf.mxu1 }
 0x113   :  { %v458_v4 = vrot.slane %v450_v1, %v3744_v63 }
 0x114   :  { %v443_v2 = vpop.f32.mrf.mxu1 }
 0x115   :  { %v451_v3 = vcombine.low %v441_v62, %v443_v2 }
 0x116   :  { %v299_v10 = vld [vmem:[#allocation2] ss:$8 sm:$0xf] }
 0x117   :  { %v465_v5 = vrot.slane %v451_v3, %v3744_v63 }
 0x119   :  { %v466_v6 = vcombine.low %v458_v4, %v465_v5 }
 0x11b   :  { %v473_v8 = vrot.slane %v466_v6, %v3744_v63 }
 0x11d   :  { %v475_v12 = vadd.f32 %v473_v8, %v299_v10 }
 0x11f   :  { %v3089_v38 = vmul.f32 -1.442695, %v475_v12  ;;  %v484_v40 = vrot.slane %v475_v12, 1  ;;  %v494_v39 = vrot.slane %v475_v12, 2  ;;  %v643_v52 = vrot.slane %v475_v12, 3 }
 0x121   :  { %3285 = vpow2.f32 %v3089_v38  ;;  %v3090_v41 = vmul.f32 -1.442695, %v484_v40 }
 0x123   :  { %3287 = vpow2.f32 %v3090_v41  ;;  %v655_v41 = vld [vmem:[#allocation2 + $0x1] ss:$8 sm:$0xf] }
 0x12e   :  { %v3286_v42 = vpop.eup %3285 }
 0x12f   :  { %v480_v43 = vadd.f32 1.0, %v3286_v42 }
 0x130   :  { %v3288_v44 = vpop.eup %3287 }
 0x131   :  { %3289 = vrcp.f32 %v480_v43  ;;  %v490_v45 = vadd.f32 1.0, %v3288_v44 }
 0x132   :  { %3291 = vtanh.f32 %v494_v39 }
 0x133   :  { %3293 = vrcp.f32 %v490_v45 }
 0x13e   :  { %v3290_v46 = vpop.eup %3289 }
 0x13f   :  { %v3292_v47 = vpop.eup %3291 }
 0x140   :  { %v3294_v48 = vpop.eup %3293  ;;  %v497_v50 = vmul.f32 %v3292_v47, %v3290_v46 }
 0x141   :  { %v493_v49 = vmul.f32 0.0, %v3294_v48 }
 0x143   :  { %v3749_v51 = vadd.f32 %v497_v50, %v493_v49 }
 0x145   :  { %3091 = vmatmul.mubr.msk.f32.vlgmr.msra.gmra.mxu0 %vm300_vm2, %v3749_v51  ;;  %3191 = vmatmul.mubr.msk.f32.vlgmr.msra.gmra.mxu1 %vm300_vm2, %v3749_v51 }
 0x146   :  { %684 = vmatpush1.msra.mxu0 %v3645_v9  ;;  %755 = vmatpush1.msra.mxu1 %v3657_v15 }
 0x147   :  { %685 = vmatprep.subr.mxu0 %v3648_v11  ;;  %756 = vmatprep.subr.mxu1 %v3662_v17 }
 0x148   :  { %686 = vmatpush1.msra.mxu0 %v3651_v13  ;;  %757 = vmatpush1.msra.mxu1 %v3668_v19 }
 0x149   :  { %687 = vmatprep.subr.mxu0 %v3659_v16  ;;  %758 = vmatprep.subr.mxu1 %v3674_v21 }
 0x14a   :  { %688 = vmatpush1.msra.mxu0 %v3664_v18  ;;  %759 = vmatpush1.msra.mxu1 %v3680_v23 }
 0x14b   :  { %689 = vmatprep.subr.mxu0 %v3670_v20  ;;  %760 = vmatprep.subr.mxu1 %v3684_v24 }
 0x14c   :  { %690 = vmatpush1.msra.mxu0 %v3676_v22  ;;  %723 = vmatprep.mubr.f32.mxu0 %v3580_v0 }
 0x14d   :  { %761 = vmatpush1.msra.mxu1 %v3688_v25  ;;  %794 = vmatprep.mubr.f32.mxu1 %v3580_v0 }
 0x14e   :  { %881 = vmatprep.subr.mxu0 %v3698_v26  ;;  %3193 = vmatprep.subr.mxu1 %v3580_v0 }
 0x205   :  { %v639_v53 = vpop.f32.mrf.mxu1  ;;  %v568_v62 = vpop.f32.mrf.mxu0 }
 0x206   :  { %v645_v54 = vadd.f32 %v643_v52, %v639_v53 }
 0x207   :  { %v3192_v55 = vpop.f32.mrf.mxu1  ;;  %v570_v1 = vpop.f32.mrf.mxu0 }
 0x208   :  { %v3093_v56 = vmul.f32 -1.442695, %v645_v54 }
 0x20a   :  { %3295 = vpow2.f32 %v3093_v56 }
 0x20b   :  { %3297 = vtanh.f32 %v3749_v51 }
 0x217   :  { %v3296_v57 = vpop.eup %3295 }
 0x218   :  { %v649_v58 = vadd.f32 1.0, %v3296_v57  ;;  %v3298_v59 = vpop.eup %3297 }
 0x21a   :  { %3299 = vrcp.f32 %v649_v58 }
 0x227   :  { %v3300_v60 = vpop.eup %3299 }
 0x228   :  { %v653_v61 = vmul.f32 %v3300_v60, %v3298_v59 }
 0x22a   :  { %3094 = vmatmul.mubr.msk.f32.vlgmr.msra.gmra.mxu0 %vm300_vm2, %v653_v61  ;;  %3095 = vmatmul.mubr.msk.f32.vlgmr.msra.gmra.mxu1 %vm300_vm2, %v653_v61 }
 0x22b   :  { %882 = vmatpush1.msra.mxu0 %v3700_v27  ;;  %3194 = vmatpush3.msra.mxu1 %v3702_v28 }
 0x22c   :  { %883 = vmatprep.subr.mxu0 %v3706_v29  ;;  %3195 = vmatprep.subr.mxu1 %v3580_v0 }
 0x22d   :  { %884 = vmatpush1.msra.mxu0 %v3708_v30  ;;  %3196 = vmatpush3.msra.mxu1 %v3710_v31 }
 0x22e   :  { %885 = vmatprep.subr.mxu0 %v3714_v32  ;;  %3197 = vmatprep.subr.mxu1 %v3580_v0 }
 0x22f   :  { %886 = vmatpush1.msra.mxu0 %v3720_v34  ;;  %3198 = vmatpush3.msra.mxu1 %v3716_v33 }
 0x230   :  { %887 = vmatprep.subr.mxu0 %v3724_v35  ;;  %3199 = vmatprep.subr.mxu1 %v3580_v0 }
 0x231   :  { %888 = vmatpush1.msra.mxu0 %v3730_v37  ;;  %921 = vmatprep.mubr.f32.mxu0 %v3580_v0 }
 0x232   :  { %3200 = vmatpush3.msra.mxu1 %v3726_v36  ;;  %3201 = vmatprep.mubr.msk.f32.mxu1 %vm3581_vm1, %v3580_v0 }
 0x233   :  { %1038 = vmatprep.subr.mxu0 %v3642_v7  ;;  %1109 = vmatprep.subr.mxu1 %v3654_v14 }
 0x2ea   :  { %v725_v2 = vpop.f32.mrf.mxu0  ;;  %v796_v3 = vpop.f32.mrf.mxu1 }
 0x2ec   :  { %v727_v4 = vpop.f32.mrf.mxu0  ;;  %v798_v5 = vpop.f32.mrf.mxu1 }
 0x2ed   :  { %v805_v6 = vcombine.low %v725_v2, %v727_v4  ;;  %v806_v8 = vcombine.low %v796_v3, %v798_v5 }
 0x2ef   :  { %v813_v10 = vrot.slane %v805_v6, %v3744_v63  ;;  %v820_v12 = vrot.slane %v806_v8, %v3744_v63 }
 0x2f1   :  { %v821_v38 = vcombine.low %v813_v10, %v820_v12 }
 0x2f3   :  { %v828_v40 = vrot.slane %v821_v38, %v3744_v63 }
 0x2f5   :  { %v830_v42 = vadd.f32 %v828_v40, %v655_v41 }
 0x2f7   :  { %v831_v39 = vadd.f32 %v830_v42, %v568_v62  ;;  %v839_v43 = vrot.slane %v830_v42, 1  ;;  %v849_v48 = vrot.slane %v830_v42, 2 }
 0x2f9   :  { %v3096_v44 = vmul.f32 -1.442695, %v831_v39  ;;  %v841_v45 = vadd.f32 %v839_v43, %v570_v1 }
 0x2fb   :  { %3301 = vpow2.f32 %v3096_v44  ;;  %v3097_v46 = vmul.f32 -1.442695, %v841_v45 }
 0x2fd   :  { %3303 = vpow2.f32 %v3097_v46  ;;  %v1010_v46 = vld [vmem:[#allocation2 + $0x2] ss:$8 sm:$0xf] }
 0x308   :  { %v3302_v47 = vpop.eup %3301 }
 0x309   :  { %v835_v49 = vadd.f32 1.0, %v3302_v47 }
 0x30a   :  { %v3304_v50 = vpop.eup %3303 }
 0x30b   :  { %3305 = vrcp.f32 %v835_v49  ;;  %v845_v52 = vadd.f32 1.0, %v3304_v50 }
 0x30c   :  { %3307 = vtanh.f32 %v849_v48 }
 0x30d   :  { %3309 = vrcp.f32 %v845_v52 }
 0x318   :  { %v3306_v53 = vpop.eup %3305 }
 0x319   :  { %v3308_v54 = vpop.eup %3307 }
 0x31a   :  { %v3310_v55 = vpop.eup %3309  ;;  %v852_v57 = vmul.f32 %v3308_v54, %v3306_v53 }
 0x31b   :  { %v848_v56 = vmul.f32 %v3310_v55, %v3749_v51  ;;  %v998_v51 = vrot.slane %v830_v42, 3 }
 0x31d   :  { %v3799_v58 = vadd.f32 %v852_v57, %v848_v56 }
 0x31f   :  { %3098 = vmatmul.mubr.msk.f32.vlgmr.msra.gmra.mxu0 %vm300_vm2, %v3799_v58  ;;  %3202 = vmatmul.mubr.msk.f32.vlgmr.msra.gmra.mxu1 %vm300_vm2, %v3799_v58 }
 0x320   :  { %1039 = vmatpush1.msra.mxu0 %v3645_v9  ;;  %1110 = vmatpush1.msra.mxu1 %v3657_v15 }
 0x321   :  { %1040 = vmatprep.subr.mxu0 %v3648_v11  ;;  %1111 = vmatprep.subr.mxu1 %v3662_v17 }
 0x322   :  { %1041 = vmatpush1.msra.mxu0 %v3651_v13  ;;  %1112 = vmatpush1.msra.mxu1 %v3668_v19 }
 0x323   :  { %1042 = vmatprep.subr.mxu0 %v3659_v16  ;;  %1113 = vmatprep.subr.mxu1 %v3674_v21 }
 0x324   :  { %1043 = vmatpush1.msra.mxu0 %v3664_v18  ;;  %1114 = vmatpush1.msra.mxu1 %v3680_v23 }
 0x325   :  { %1044 = vmatprep.subr.mxu0 %v3670_v20  ;;  %1115 = vmatprep.subr.mxu1 %v3684_v24 }
 0x326   :  { %1045 = vmatpush1.msra.mxu0 %v3676_v22  ;;  %1078 = vmatprep.mubr.f32.mxu0 %v3580_v0 }
 0x327   :  { %1116 = vmatpush1.msra.mxu1 %v3688_v25  ;;  %1149 = vmatprep.mubr.f32.mxu1 %v3580_v0 }
 0x328   :  { %1236 = vmatprep.subr.mxu0 %v3698_v26  ;;  %3204 = vmatprep.subr.mxu1 %v3580_v0 }
 0x3df   :  { %v994_v59 = vpop.f32.mrf.mxu1  ;;  %v923_v6 = vpop.f32.mrf.mxu0 }
 0x3e0   :  { %v1000_v60 = vadd.f32 %v998_v51, %v994_v59 }
 0x3e1   :  { %v3203_v61 = vpop.f32.mrf.mxu1  ;;  %v925_v8 = vpop.f32.mrf.mxu0 }
 0x3e2   :  { %v3100_v62 = vmul.f32 -1.442695, %v1000_v60 }
 0x3e4   :  { %3311 = vpow2.f32 %v3100_v62 }
 0x3e5   :  { %3313 = vtanh.f32 %v3799_v58 }
 0x3f1   :  { %v3312_v1 = vpop.eup %3311 }
 0x3f2   :  { %v1004_v2 = vadd.f32 1.0, %v3312_v1  ;;  %v3314_v3 = vpop.eup %3313 }
 0x3f4   :  { %3315 = vrcp.f32 %v1004_v2 }
 0x401   :  { %v3316_v4 = vpop.eup %3315 }
 0x402   :  { %v1008_v5 = vmul.f32 %v3316_v4, %v3314_v3 }
 0x404   :  { %3101 = vmatmul.mubr.msk.f32.vlgmr.msra.gmra.mxu0 %vm300_vm2, %v1008_v5  ;;  %3102 = vmatmul.mubr.msk.f32.vlgmr.msra.gmra.mxu1 %vm300_vm2, %v1008_v5 }
 0x405   :  { %1237 = vmatpush1.msra.mxu0 %v3700_v27  ;;  %3205 = vmatpush3.msra.mxu1 %v3702_v28 }
 0x406   :  { %1238 = vmatprep.subr.mxu0 %v3706_v29  ;;  %3206 = vmatprep.subr.mxu1 %v3580_v0 }
 0x407   :  { %1239 = vmatpush1.msra.mxu0 %v3708_v30  ;;  %3207 = vmatpush3.msra.mxu1 %v3710_v31 }
 0x408   :  { %1240 = vmatprep.subr.mxu0 %v3714_v32  ;;  %3208 = vmatprep.subr.mxu1 %v3580_v0 }
 0x409   :  { %1241 = vmatpush1.msra.mxu0 %v3720_v34  ;;  %3209 = vmatpush3.msra.mxu1 %v3716_v33 }
 0x40a   :  { %1242 = vmatprep.subr.mxu0 %v3724_v35  ;;  %3210 = vmatprep.subr.mxu1 %v3580_v0 }
 0x40b   :  { %1243 = vmatpush1.msra.mxu0 %v3730_v37  ;;  %1276 = vmatprep.mubr.f32.mxu0 %v3580_v0 }
 0x40c   :  { %3211 = vmatpush3.msra.mxu1 %v3726_v36  ;;  %3212 = vmatprep.mubr.msk.f32.mxu1 %vm3581_vm1, %v3580_v0 }
 0x40d   :  { %1393 = vmatprep.subr.mxu0 %v3642_v7  ;;  %1464 = vmatprep.subr.mxu1 %v3654_v14 }
 0x4c4   :  { %v1080_v10 = vpop.f32.mrf.mxu0  ;;  %v1151_v12 = vpop.f32.mrf.mxu1 }
 0x4c6   :  { %v1082_v38 = vpop.f32.mrf.mxu0  ;;  %v1153_v40 = vpop.f32.mrf.mxu1 }
 0x4c7   :  { %v1160_v41 = vcombine.low %v1080_v10, %v1082_v38  ;;  %v1161_v42 = vcombine.low %v1151_v12, %v1153_v40 }
 0x4c9   :  { %v1168_v39 = vrot.slane %v1160_v41, %v3744_v63  ;;  %v1175_v43 = vrot.slane %v1161_v42, %v3744_v63 }
 0x4cb   :  { %v1176_v44 = vcombine.low %v1168_v39, %v1175_v43 }
 0x4cd   :  { %v1183_v45 = vrot.slane %v1176_v44, %v3744_v63 }
 0x4cf   :  { %v1185_v47 = vadd.f32 %v1183_v45, %v1010_v46 }
 0x4d1   :  { %v1186_v48 = vadd.f32 %v1185_v47, %v923_v6  ;;  %v1194_v49 = vrot.slane %v1185_v47, 1  ;;  %v1204_v55 = vrot.slane %v1185_v47, 2 }
 0x4d3   :  { %v3103_v50 = vmul.f32 -1.442695, %v1186_v48  ;;  %v1196_v52 = vadd.f32 %v1194_v49, %v925_v8 }
 0x4d5   :  { %3317 = vpow2.f32 %v3103_v50  ;;  %v3104_v53 = vmul.f32 -1.442695, %v1196_v52 }
 0x4d7   :  { %3319 = vpow2.f32 %v3104_v53  ;;  %v1365_v53 = vld [vmem:[#allocation2 + $0x3] ss:$8 sm:$0xf] }
 0x4e2   :  { %v3318_v54 = vpop.eup %3317 }
 0x4e3   :  { %v1190_v56 = vadd.f32 1.0, %v3318_v54 }
 0x4e4   :  { %v3320_v57 = vpop.eup %3319 }
 0x4e5   :  { %3321 = vrcp.f32 %v1190_v56  ;;  %v1200_v51 = vadd.f32 1.0, %v3320_v57 }
 0x4e6   :  { %3323 = vtanh.f32 %v1204_v55 }
 0x4e7   :  { %3325 = vrcp.f32 %v1200_v51 }
 0x4f2   :  { %v3322_v59 = vpop.eup %3321 }
 0x4f3   :  { %v3324_v60 = vpop.eup %3323 }
 0x4f4   :  { %v3326_v61 = vpop.eup %3325  ;;  %v1207_v1 = vmul.f32 %v3324_v60, %v3322_v59 }
 0x4f5   :  { %v1203_v62 = vmul.f32 %v3326_v61, %v3799_v58  ;;  %v1353_v58 = vrot.slane %v1185_v47, 3 }
 0x4f7   :  { %v3849_v2 = vadd.f32 %v1207_v1, %v1203_v62 }
 0x4f9   :  { %3105 = vmatmul.mubr.msk.f32.vlgmr.msra.gmra.mxu0 %vm300_vm2, %v3849_v2  ;;  %3213 = vmatmul.mubr.msk.f32.vlgmr.msra.gmra.mxu1 %vm300_vm2, %v3849_v2 }
 0x4fa   :  { %1394 = vmatpush1.msra.mxu0 %v3645_v9  ;;  %1465 = vmatpush1.msra.mxu1 %v3657_v15 }
 0x4fb   :  { %1395 = vmatprep.subr.mxu0 %v3648_v11  ;;  %1466 = vmatprep.subr.mxu1 %v3662_v17 }
 0x4fc   :  { %1396 = vmatpush1.msra.mxu0 %v3651_v13  ;;  %1467 = vmatpush1.msra.mxu1 %v3668_v19 }
 0x4fd   :  { %1397 = vmatprep.subr.mxu0 %v3659_v16  ;;  %1468 = vmatprep.subr.mxu1 %v3674_v21 }
 0x4fe   :  { %1398 = vmatpush1.msra.mxu0 %v3664_v18  ;;  %1469 = vmatpush1.msra.mxu1 %v3680_v23 }
 0x4ff   :  { %1399 = vmatprep.subr.mxu0 %v3670_v20  ;;  %1470 = vmatprep.subr.mxu1 %v3684_v24 }
 0x500   :  { %1400 = vmatpush1.msra.mxu0 %v3676_v22  ;;  %1433 = vmatprep.mubr.f32.mxu0 %v3580_v0 }
 0x501   :  { %1471 = vmatpush1.msra.mxu1 %v3688_v25  ;;  %1504 = vmatprep.mubr.f32.mxu1 %v3580_v0 }
 0x502   :  { %1591 = vmatprep.subr.mxu0 %v3698_v26  ;;  %3215 = vmatprep.subr.mxu1 %v3580_v0 }
 0x5b9   :  { %v1349_v3 = vpop.f32.mrf.mxu1  ;;  %v1278_v41 = vpop.f32.mrf.mxu0 }
 0x5ba   :  { %v1355_v4 = vadd.f32 %v1353_v58, %v1349_v3 }
 0x5bb   :  { %v3214_v5 = vpop.f32.mrf.mxu1  ;;  %v1280_v42 = vpop.f32.mrf.mxu0 }
 0x5bc   :  { %v3107_v6 = vmul.f32 -1.442695, %v1355_v4 }
 0x5be   :  { %3327 = vpow2.f32 %v3107_v6 }
 0x5bf   :  { %3329 = vtanh.f32 %v3849_v2 }
 0x5cb   :  { %v3328_v8 = vpop.eup %3327 }
 0x5cc   :  { %v1359_v10 = vadd.f32 1.0, %v3328_v8  ;;  %v3330_v12 = vpop.eup %3329 }
 0x5ce   :  { %3331 = vrcp.f32 %v1359_v10 }
 0x5db   :  { %v3332_v38 = vpop.eup %3331 }
 0x5dc   :  { %v1363_v40 = vmul.f32 %v3332_v38, %v3330_v12 }
 0x5de   :  { %3108 = vmatmul.mubr.msk.f32.vlgmr.msra.gmra.mxu0 %vm300_vm2, %v1363_v40  ;;  %3109 = vmatmul.mubr.msk.f32.vlgmr.msra.gmra.mxu1 %vm300_vm2, %v1363_v40 }
 0x5df   :  { %1592 = vmatpush1.msra.mxu0 %v3700_v27  ;;  %3216 = vmatpush3.msra.mxu1 %v3702_v28 }
 0x5e0   :  { %1593 = vmatprep.subr.mxu0 %v3706_v29  ;;  %3217 = vmatprep.subr.mxu1 %v3580_v0 }
 0x5e1   :  { %1594 = vmatpush1.msra.mxu0 %v3708_v30  ;;  %3218 = vmatpush3.msra.mxu1 %v3710_v31 }
 0x5e2   :  { %1595 = vmatprep.subr.mxu0 %v3714_v32  ;;  %3219 = vmatprep.subr.mxu1 %v3580_v0 }
 0x5e3   :  { %1596 = vmatpush1.msra.mxu0 %v3720_v34  ;;  %3220 = vmatpush3.msra.mxu1 %v3716_v33 }
 0x5e4   :  { %1597 = vmatprep.subr.mxu0 %v3724_v35  ;;  %3221 = vmatprep.subr.mxu1 %v3580_v0 }
 0x5e5   :  { %1598 = vmatpush1.msra.mxu0 %v3730_v37  ;;  %1631 = vmatprep.mubr.f32.mxu0 %v3580_v0 }
 0x5e6   :  { %3222 = vmatpush3.msra.mxu1 %v3726_v36  ;;  %3223 = vmatprep.mubr.msk.f32.mxu1 %vm3581_vm1, %v3580_v0 }
 0x5e7   :  { %1748 = vmatprep.subr.mxu0 %v3642_v7  ;;  %1819 = vmatprep.subr.mxu1 %v3654_v14 }
 0x69e   :  { %v1435_v39 = vpop.f32.mrf.mxu0  ;;  %v1506_v43 = vpop.f32.mrf.mxu1 }
 0x6a0   :  { %v1437_v44 = vpop.f32.mrf.mxu0  ;;  %v1508_v45 = vpop.f32.mrf.mxu1 }
 0x6a1   :  { %v1515_v46 = vcombine.low %v1435_v39, %v1437_v44  ;;  %v1516_v47 = vcombine.low %v1506_v43, %v1508_v45 }
 0x6a3   :  { %v1523_v48 = vrot.slane %v1515_v46, %v3744_v63  ;;  %v1530_v49 = vrot.slane %v1516_v47, %v3744_v63 }
 0x6a5   :  { %v1531_v50 = vcombine.low %v1523_v48, %v1530_v49 }
 0x6a7   :  { %v1538_v52 = vrot.slane %v1531_v50, %v3744_v63 }
 0x6a9   :  { %v1540_v54 = vadd.f32 %v1538_v52, %v1365_v53 }
 0x6ab   :  { %v1541_v55 = vadd.f32 %v1540_v54, %v1278_v41  ;;  %v1549_v56 = vrot.slane %v1540_v54, 1  ;;  %v1559_v61 = vrot.slane %v1540_v54, 2 }
 0x6ad   :  { %v3110_v57 = vmul.f32 -1.442695, %v1541_v55  ;;  %v1551_v51 = vadd.f32 %v1549_v56, %v1280_v42 }
 0x6af   :  { %3333 = vpow2.f32 %v3110_v57  ;;  %v3111_v59 = vmul.f32 -1.442695, %v1551_v51 }
 0x6b1   :  { %3335 = vpow2.f32 %v3111_v59  ;;  %v1720_v59 = vld [vmem:[#allocation2 + $0x4] ss:$8 sm:$0xf] }
 0x6bc   :  { %v3334_v60 = vpop.eup %3333 }
 0x6bd   :  { %v1545_v62 = vadd.f32 1.0, %v3334_v60 }
 0x6be   :  { %v3336_v1 = vpop.eup %3335 }
 0x6bf   :  { %3337 = vrcp.f32 %v1545_v62  ;;  %v1555_v58 = vadd.f32 1.0, %v3336_v1 }
 0x6c0   :  { %3339 = vtanh.f32 %v1559_v61 }
 0x6c1   :  { %3341 = vrcp.f32 %v1555_v58 }
 0x6cc   :  { %v3338_v3 = vpop.eup %3337 }
 0x6cd   :  { %v3340_v4 = vpop.eup %3339 }
 0x6ce   :  { %v3342_v5 = vpop.eup %3341  ;;  %v1562_v8 = vmul.f32 %v3340_v4, %v3338_v3 }
 0x6cf   :  { %v1558_v6 = vmul.f32 %v3342_v5, %v3849_v2  ;;  %v1708_v2 = vrot.slane %v1540_v54, 3 }
 0x6d1   :  { %v3899_v10 = vadd.f32 %v1562_v8, %v1558_v6 }
 0x6d3   :  { %3112 = vmatmul.mubr.msk.f32.vlgmr.msra.gmra.mxu0 %vm300_vm2, %v3899_v10  ;;  %3224 = vmatmul.mubr.msk.f32.vlgmr.msra.gmra.mxu1 %vm300_vm2, %v3899_v10 }
 0x6d4   :  { %1749 = vmatpush1.msra.mxu0 %v3645_v9  ;;  %1820 = vmatpush1.msra.mxu1 %v3657_v15 }
 0x6d5   :  { %1750 = vmatprep.subr.mxu0 %v3648_v11  ;;  %1821 = vmatprep.subr.mxu1 %v3662_v17 }
 0x6d6   :  { %1751 = vmatpush1.msra.mxu0 %v3651_v13  ;;  %1822 = vmatpush1.msra.mxu1 %v3668_v19 }
 0x6d7   :  { %1752 = vmatprep.subr.mxu0 %v3659_v16  ;;  %1823 = vmatprep.subr.mxu1 %v3674_v21 }
 0x6d8   :  { %1753 = vmatpush1.msra.mxu0 %v3664_v18  ;;  %1824 = vmatpush1.msra.mxu1 %v3680_v23 }
 0x6d9   :  { %1754 = vmatprep.subr.mxu0 %v3670_v20  ;;  %1825 = vmatprep.subr.mxu1 %v3684_v24 }
 0x6da   :  { %1755 = vmatpush1.msra.mxu0 %v3676_v22  ;;  %1788 = vmatprep.mubr.f32.mxu0 %v3580_v0 }
 0x6db   :  { %1826 = vmatpush1.msra.mxu1 %v3688_v25  ;;  %1859 = vmatprep.mubr.f32.mxu1 %v3580_v0 }
 0x6dc   :  { %1946 = vmatprep.subr.mxu0 %v3698_v26  ;;  %3226 = vmatprep.subr.mxu1 %v3580_v0 }
 0x793   :  { %v1704_v12 = vpop.f32.mrf.mxu1  ;;  %v1633_v46 = vpop.f32.mrf.mxu0 }
 0x794   :  { %v1710_v38 = vadd.f32 %v1708_v2, %v1704_v12 }
 0x795   :  { %v3225_v40 = vpop.f32.mrf.mxu1  ;;  %v1635_v47 = vpop.f32.mrf.mxu0 }
 0x796   :  { %v3114_v41 = vmul.f32 -1.442695, %v1710_v38 }
 0x798   :  { %3343 = vpow2.f32 %v3114_v41 }
 0x799   :  { %3345 = vtanh.f32 %v3899_v10 }
 0x7a5   :  { %v3344_v42 = vpop.eup %3343 }
 0x7a6   :  { %v1714_v39 = vadd.f32 1.0, %v3344_v42  ;;  %v3346_v43 = vpop.eup %3345 }
 0x7a8   :  { %3347 = vrcp.f32 %v1714_v39 }
 0x7b5   :  { %v3348_v44 = vpop.eup %3347 }
 0x7b6   :  { %v1718_v45 = vmul.f32 %v3348_v44, %v3346_v43 }
 0x7b8   :  { %3115 = vmatmul.mubr.msk.f32.vlgmr.msra.gmra.mxu0 %vm300_vm2, %v1718_v45  ;;  %3116 = vmatmul.mubr.msk.f32.vlgmr.msra.gmra.mxu1 %vm300_vm2, %v1718_v45 }
 0x7b9   :  { %1947 = vmatpush1.msra.mxu0 %v3700_v27  ;;  %3227 = vmatpush3.msra.mxu1 %v3702_v28 }
 0x7ba   :  { %1948 = vmatprep.subr.mxu0 %v3706_v29  ;;  %3228 = vmatprep.subr.mxu1 %v3580_v0 }
 0x7bb   :  { %1949 = vmatpush1.msra.mxu0 %v3708_v30  ;;  %3229 = vmatpush3.msra.mxu1 %v3710_v31 }
 0x7bc   :  { %1950 = vmatprep.subr.mxu0 %v3714_v32  ;;  %3230 = vmatprep.subr.mxu1 %v3580_v0 }
 0x7bd   :  { %1951 = vmatpush1.msra.mxu0 %v3720_v34  ;;  %3231 = vmatpush3.msra.mxu1 %v3716_v33 }
 0x7be   :  { %1952 = vmatprep.subr.mxu0 %v3724_v35  ;;  %3232 = vmatprep.subr.mxu1 %v3580_v0 }
 0x7bf   :  { %1953 = vmatpush1.msra.mxu0 %v3730_v37  ;;  %1986 = vmatprep.mubr.f32.mxu0 %v3580_v0 }
 0x7c0   :  { %3233 = vmatpush3.msra.mxu1 %v3726_v36  ;;  %3234 = vmatprep.mubr.msk.f32.mxu1 %vm3581_vm1, %v3580_v0 }
 0x7c1   :  { %2103 = vmatprep.subr.mxu0 %v3642_v7  ;;  %2174 = vmatprep.subr.mxu1 %v3654_v14 }
 0x878   :  { %v1790_v48 = vpop.f32.mrf.mxu0  ;;  %v1861_v49 = vpop.f32.mrf.mxu1 }
 0x87a   :  { %v1792_v50 = vpop.f32.mrf.mxu0  ;;  %v1863_v52 = vpop.f32.mrf.mxu1 }
 0x87b   :  { %v1870_v53 = vcombine.low %v1790_v48, %v1792_v50  ;;  %v1871_v54 = vcombine.low %v1861_v49, %v1863_v52 }
 0x87d   :  { %v1878_v55 = vrot.slane %v1870_v53, %v3744_v63  ;;  %v1885_v56 = vrot.slane %v1871_v54, %v3744_v63 }
 0x87f   :  { %v1886_v57 = vcombine.low %v1878_v55, %v1885_v56 }
 0x881   :  { %v1893_v51 = vrot.slane %v1886_v57, %v3744_v63  ;;  %v4009_v57 = vld [vmem:[#allocation8 + $0x60] sm:$0xff] }
 0x883   :  { %v1895_v60 = vadd.f32 %v1893_v51, %v1720_v59  ;;  %v4012_v51 = vld [vmem:[#allocation8 + $0x70] sm:$0xff]  ;;  %v4015_v59 = vld [vmem:[#allocation8 + $0x48] sm:$0xff] }
 0x885   :  { %v1896_v7 = vadd.f32 %v1895_v60, %v1633_v46  ;;  %v1904_v61 = vrot.slane %v1895_v60, 1  ;;  %v1914_v3 = vrot.slane %v1895_v60, 2 }
 0x887   :  { %v3117_v14 = vmul.f32 -1.442695, %v1896_v7  ;;  %v1906_v62 = vadd.f32 %v1904_v61, %v1635_v47  ;;  %v4021_v7 = vld [vmem:[#allocation8 + $0x40] sm:$0xff]  ;;  %v4024_v61 = vld [vmem:[#allocation8 + $0x50] sm:$0xff] }
 0x889   :  { %3349 = vpow2.f32 %v3117_v14  ;;  %v3118_v1 = vmul.f32 -1.442695, %v1906_v62  ;;  %v4027_v14 = vld [vmem:[#allocation8 + $0x28] sm:$0xff]  ;;  %v4030_v62 = vld [vmem:[#allocation8 + $0x38] sm:$0xff] }
 0x88b   :  { %3351 = vpow2.f32 %v3118_v1  ;;  %v4033_v1 = vld [vmem:[#allocation8 + $0x20] sm:$0xff] }
 0x896   :  { %v3350_v58 = vpop.eup %3349 }
 0x897   :  { %v1900_v4 = vadd.f32 1.0, %v3350_v58  ;;  %v4036_v58 = vld [vmem:[#allocation8 + $0x30] sm:$0xff] }
 0x898   :  { %v3352_v5 = vpop.eup %3351 }
 0x899   :  { %3353 = vrcp.f32 %v1900_v4  ;;  %v1910_v6 = vadd.f32 1.0, %v3352_v5  ;;  %v4042_v4 = vld [vmem:[#allocation8 + $0x18] sm:$0xff]  ;;  %v4045_v5 = vld [vmem:[#allocation8] sm:$0xff] }
 0x89a   :  { %3355 = vtanh.f32 %v1914_v3  ;;  %v4039_v3 = vld [vmem:[#allocation8 + $0x8] sm:$0xff] }
 0x89b   :  { %3357 = vrcp.f32 %v1910_v6  ;;  %v4049_v6 = vld [vmem:[#allocation8 + $0x10] sm:$0xff] }
 0x8a6   :  { %v3354_v8 = vpop.eup %3353 }
 0x8a7   :  { %v3356_v2 = vpop.eup %3355 }
 0x8a8   :  { %v3358_v12 = vpop.eup %3357  ;;  %v1917_v40 = vmul.f32 %v3356_v2, %v3354_v8  ;;  %v3429_v8 = vld [vmem:[#allocation9 + $0x38] sm:$0xff] }
 0x8a9   :  { %v1913_v38 = vmul.f32 %v3358_v12, %v3899_v10 }
 0x8ab   :  { %v3949_v41 = vadd.f32 %v1917_v40, %v1913_v38 }
 0x8ad   :  { %3119 = vmatmul.mubr.msk.f32.vlgmr.msra.gmra.mxu0 %vm300_vm2, %v3949_v41  ;;  %3235 = vmatmul.mubr.msk.f32.vlgmr.msra.gmra.mxu1 %vm300_vm2, %v3949_v41 }
 0x8ae   :  { %2104 = vmatpush1.msra.mxu0 %v3645_v9  ;;  %2175 = vmatpush1.msra.mxu1 %v3657_v15  ;;  %v2063_v9 = vrot.slane %v1895_v60, 3  ;;  %v4018_v60 = vld [vmem:[#allocation8 + $0x58] sm:$0xff] }
 0x8af   :  { %2105 = vmatprep.subr.mxu0 %v3648_v11  ;;  %2176 = vmatprep.subr.mxu1 %v3662_v17 }
 0x8b0   :  { %2106 = vmatpush1.msra.mxu0 %v3651_v13  ;;  %2177 = vmatpush1.msra.mxu1 %v3668_v19 }
 0x8b1   :  { %2107 = vmatprep.subr.mxu0 %v3659_v16  ;;  %2178 = vmatprep.subr.mxu1 %v3674_v21 }
 0x8b2   :  { %2108 = vmatpush1.msra.mxu0 %v3664_v18  ;;  %2179 = vmatpush1.msra.mxu1 %v3680_v23  ;;  %v3996_v23 = vld [vmem:[#allocation8 + $0x78] sm:$0xff] }
 0x8b3   :  { %2109 = vmatprep.subr.mxu0 %v3670_v20  ;;  %2180 = vmatprep.subr.mxu1 %v3684_v24 }
 0x8b4   :  { %2110 = vmatpush1.msra.mxu0 %v3676_v22  ;;  %2143 = vmatprep.mubr.f32.mxu0 %v3580_v0  ;;  %v3993_v22 = vld [vmem:[#allocation8 + $0x68] sm:$0xff] }
 0x8b5   :  { %2181 = vmatpush1.msra.mxu1 %v3688_v25  ;;  %2214 = vmatprep.mubr.f32.mxu1 %v3580_v0 }
 0x8b6   :  { %2301 = vmatprep.subr.mxu0 %v3698_v26  ;;  %3237 = vmatprep.subr.mxu1 %v3580_v0 }
 0x96d   :  { %v2059_v11 = vpop.f32.mrf.mxu1  ;;  %v1988_v24 = vpop.f32.mrf.mxu0 }
 0x96e   :  { %v2065_v13 = vadd.f32 %v2063_v9, %v2059_v11 }
 0x96f   :  { %v3236_v15 = vpop.f32.mrf.mxu1  ;;  %v1990_v25 = vpop.f32.mrf.mxu0 }
 0x970   :  { %v3121_v16 = vmul.f32 -1.442695, %v2065_v13 }
 0x972   :  { %3359 = vpow2.f32 %v3121_v16 }
 0x973   :  { %3361 = vtanh.f32 %v3949_v41 }
 0x97f   :  { %v3360_v17 = vpop.eup %3359 }
 0x980   :  { %v2069_v18 = vadd.f32 1.0, %v3360_v17  ;;  %v3362_v19 = vpop.eup %3361  ;;  %v3430_v17 = vld [vmem:[#allocation9 + $0x30] sm:$0xff] }
 0x982   :  { %3363 = vrcp.f32 %v2069_v18  ;;  %v4057_v18 = vld [vmem:[#allocation11 + $0x18] sm:$0xff] }
 0x98f   :  { %v3364_v20 = vpop.eup %3363 }
 0x990   :  { %v2073_v21 = vmul.f32 %v3364_v20, %v3362_v19  ;;  %v3432_v19 = vld [vmem:[#allocation9 + $0x28] sm:$0xff]  ;;  %v3433_v20 = vld [vmem:[#allocation9 + $0x20] sm:$0xff] }
 0x992   :  { %3122 = vmatmul.mubr.msk.f32.vlgmr.msra.gmra.mxu0 %vm300_vm2, %v2073_v21  ;;  %3123 = vmatmul.mubr.msk.f32.vlgmr.msra.gmra.mxu1 %vm300_vm2, %v2073_v21  ;;  %v4061_v21 = vld [vmem:[#allocation11 + $0x10] sm:$0xff] }
 0x993   :  { %2302 = vmatpush1.msra.mxu0 %v3700_v27  ;;  %3238 = vmatpush3.msra.mxu1 %v3702_v28 }
 0x994   :  { %2303 = vmatprep.subr.mxu0 %v3706_v29  ;;  %3239 = vmatprep.subr.mxu1 %v3580_v0 }
 0x995   :  { %2304 = vmatpush1.msra.mxu0 %v3708_v30  ;;  %3240 = vmatpush3.msra.mxu1 %v3710_v31 }
 0x996   :  { %2305 = vmatprep.subr.mxu0 %v3714_v32  ;;  %3241 = vmatprep.subr.mxu1 %v3580_v0 }
 0x997   :  { %2306 = vmatpush1.msra.mxu0 %v3720_v34  ;;  %3242 = vmatpush3.msra.mxu1 %v3716_v33 }
 0x998   :  { %2307 = vmatprep.subr.mxu0 %v3724_v35  ;;  %3243 = vmatprep.subr.mxu1 %v3580_v0 }
 0x999   :  { %2308 = vmatpush1.msra.mxu0 %v3730_v37  ;;  %2341 = vmatprep.mubr.f32.mxu0 %v3580_v0 }
 0x99a   :  { %3244 = vmatpush3.msra.mxu1 %v3726_v36  ;;  %3245 = vmatprep.mubr.msk.f32.mxu1 %vm3581_vm1, %v3580_v0  ;;  %v2075_v36 = vld [vmem:[#allocation2 + $0x5] ss:$8 sm:$0xf] }
 0x99b   :  { %2458 = vmatprep.subr.mxu0 %v3993_v22  ;;  %2529 = vmatprep.subr.mxu1 %v3996_v23 }
 0xa52   :  { %v2145_v26 = vpop.f32.mrf.mxu0  ;;  %v2216_v27 = vpop.f32.mrf.mxu1 }
 0xa54   :  { %v2147_v28 = vpop.f32.mrf.mxu0  ;;  %v2218_v29 = vpop.f32.mrf.mxu1 }
 0xa55   :  { %v2225_v30 = vcombine.low %v2145_v26, %v2147_v28  ;;  %v2226_v31 = vcombine.low %v2216_v27, %v2218_v29  ;;  %v4065_v26 = vld [vmem:[#allocation11 + $0x8] sm:$0xff]  ;;  %v3439_v28 = vld [vmem:[#allocation9] sm:$0xff] }
 0xa56   :  { %v3438_v27 = vld [vmem:[#allocation9 + $0x8] sm:$0xff]  ;;  %v4070_v29 = vld [vmem:[#allocation11] sm:$0xff] }
 0xa57   :  { %v2233_v32 = vrot.slane %v2225_v30, %v3744_v63  ;;  %v2240_v33 = vrot.slane %v2226_v31, %v3744_v63 }
 0xa59   :  { %v2241_v34 = vcombine.low %v2233_v32, %v2240_v33 }
 0xa5b   :  { %v2248_v35 = vrot.slane %v2241_v34, %v3744_v63 }
 0xa5d   :  { %v2250_v37 = vadd.f32 %v2248_v35, %v2075_v36 }
 0xa5f   :  { %v2251_v10 = vadd.f32 %v2250_v37, %v1988_v24  ;;  %v2259_v42 = vrot.slane %v2250_v37, 1  ;;  %v2269_v46 = vrot.slane %v2250_v37, 2  ;;  %v2418_v2 = vrot.slane %v2250_v37, 3  ;;  %v3435_v24 = vld [vmem:[#allocation9 + $0x18] sm:$0xff] }
 0xa61   :  { %v3124_v39 = vmul.f32 -1.442695, %v2251_v10  ;;  %v2261_v43 = vadd.f32 %v2259_v42, %v1990_v25  ;;  %v3436_v25 = vld [vmem:[#allocation9 + $0x10] sm:$0xff] }
 0xa63   :  { %3365 = vpow2.f32 %v3124_v39  ;;  %v3125_v44 = vmul.f32 -1.442695, %v2261_v43 }
 0xa65   :  { %3367 = vpow2.f32 %v3125_v44  ;;  %v2430_v44 = vld [vmem:[#allocation2 + $0x6] ss:$8 sm:$0xf] }
 0xa70   :  { %v3366_v45 = vpop.eup %3365 }
 0xa71   :  { %v2255_v47 = vadd.f32 1.0, %v3366_v45 }
 0xa72   :  { %v3368_v48 = vpop.eup %3367 }
 0xa73   :  { %3369 = vrcp.f32 %v2255_v47  ;;  %v2265_v49 = vadd.f32 1.0, %v3368_v48 }
 0xa74   :  { %3371 = vtanh.f32 %v2269_v46 }
 0xa75   :  { %3373 = vrcp.f32 %v2265_v49 }
 0xa80   :  { %v3370_v50 = vpop.eup %3369 }
 0xa81   :  { %v3372_v52 = vpop.eup %3371 }
 0xa82   :  { %v3374_v53 = vpop.eup %3373  ;;  %v2272_v55 = vmul.f32 %v3372_v52, %v3370_v50 }
 0xa83   :  { %v2268_v54 = vmul.f32 %v3374_v53, %v3949_v41 }
 0xa85   :  { %v4003_v56 = vadd.f32 %v2272_v55, %v2268_v54 }
 0xa87   :  { %3126 = vmatmul.mubr.msk.f32.vlgmr.msra.gmra.mxu0 %vm300_vm2, %v4003_v56  ;;  %3246 = vmatmul.mubr.msk.f32.vlgmr.msra.gmra.mxu1 %vm300_vm2, %v4003_v56 }
 0xa88   :  { %2459 = vmatpush1.msra.mxu0 %v4009_v57  ;;  %2530 = vmatpush1.msra.mxu1 %v4012_v51 }
 0xa89   :  { %2460 = vmatprep.subr.mxu0 %v4015_v59  ;;  %2531 = vmatprep.subr.mxu1 %v4018_v60 }
 0xa8a   :  { %2461 = vmatpush1.msra.mxu0 %v4021_v7  ;;  %2532 = vmatpush1.msra.mxu1 %v4024_v61 }
 0xa8b   :  { %2462 = vmatprep.subr.mxu0 %v4027_v14  ;;  %2533 = vmatprep.subr.mxu1 %v4030_v62 }
 0xa8c   :  { %2463 = vmatpush1.msra.mxu0 %v4033_v1  ;;  %2534 = vmatpush1.msra.mxu1 %v4036_v58 }
 0xa8d   :  { %2464 = vmatprep.subr.mxu0 %v4039_v3  ;;  %2535 = vmatprep.subr.mxu1 %v4042_v4 }
 0xa8e   :  { %2465 = vmatpush1.msra.mxu0 %v4045_v5  ;;  %2498 = vmatprep.mubr.f32.mxu0 %v3580_v0 }
 0xa8f   :  { %2536 = vmatpush1.msra.mxu1 %v4049_v6  ;;  %2569 = vmatprep.mubr.f32.mxu1 %v3580_v0 }
 0xa90   :  { %2656 = vmatprep.subr.mxu0 %v3429_v8  ;;  %3248 = vmatprep.subr.mxu1 %v3580_v0 }
 0xb47   :  { %v2414_v12 = vpop.f32.mrf.mxu1  ;;  %v2343_v30 = vpop.f32.mrf.mxu0 }
 0xb48   :  { %v2420_v38 = vadd.f32 %v2418_v2, %v2414_v12 }
 0xb49   :  { %v3247_v40 = vpop.f32.mrf.mxu1  ;;  %v2345_v31 = vpop.f32.mrf.mxu0 }
 0xb4a   :  { %v3128_v41 = vmul.f32 -1.442695, %v2420_v38 }
 0xb4c   :  { %3375 = vpow2.f32 %v3128_v41 }
 0xb4d   :  { %3377 = vtanh.f32 %v4003_v56 }
 0xb59   :  { %v3376_v9 = vpop.eup %3375 }
 0xb5a   :  { %v2424_v11 = vadd.f32 1.0, %v3376_v9  ;;  %v3378_v13 = vpop.eup %3377 }
 0xb5c   :  { %3379 = vrcp.f32 %v2424_v11 }
 0xb69   :  { %v3380_v15 = vpop.eup %3379 }
 0xb6a   :  { %v2428_v16 = vmul.f32 %v3380_v15, %v3378_v13 }
 0xb6c   :  { %3129 = vmatmul.mubr.msk.f32.vlgmr.msra.gmra.mxu0 %vm300_vm2, %v2428_v16  ;;  %3130 = vmatmul.mubr.msk.f32.vlgmr.msra.gmra.mxu1 %vm300_vm2, %v2428_v16 }
 0xb6d   :  { %2657 = vmatpush1.msra.mxu0 %v3430_v17  ;;  %3249 = vmatpush3.msra.mxu1 %v4057_v18 }
 0xb6e   :  { %2658 = vmatprep.subr.mxu0 %v3432_v19  ;;  %3250 = vmatprep.subr.mxu1 %v3580_v0 }
 0xb6f   :  { %2659 = vmatpush1.msra.mxu0 %v3433_v20  ;;  %3251 = vmatpush3.msra.mxu1 %v4061_v21 }
 0xb70   :  { %2660 = vmatprep.subr.mxu0 %v3435_v24  ;;  %3252 = vmatprep.subr.mxu1 %v3580_v0 }
 0xb71   :  { %2661 = vmatpush1.msra.mxu0 %v3436_v25  ;;  %3253 = vmatpush3.msra.mxu1 %v4065_v26 }
 0xb72   :  { %2662 = vmatprep.subr.mxu0 %v3438_v27  ;;  %3254 = vmatprep.subr.mxu1 %v3580_v0 }
 0xb73   :  { %2663 = vmatpush1.msra.mxu0 %v3439_v28  ;;  %2696 = vmatprep.mubr.f32.mxu0 %v3580_v0 }
 0xb74   :  { %3255 = vmatpush3.msra.mxu1 %v4070_v29  ;;  %3256 = vmatprep.mubr.msk.f32.mxu1 %vm3581_vm1, %v3580_v0 }
 0xb75   :  { %2813 = vmatprep.subr.mxu0 %v3993_v22  ;;  %2884 = vmatprep.subr.mxu1 %v3996_v23 }
 0xc2c   :  { %v2500_v32 = vpop.f32.mrf.mxu0  ;;  %v2571_v33 = vpop.f32.mrf.mxu1 }
 0xc2e   :  { %v2502_v34 = vpop.f32.mrf.mxu0  ;;  %v2573_v35 = vpop.f32.mrf.mxu1 }
 0xc2f   :  { %v2580_v36 = vcombine.low %v2500_v32, %v2502_v34  ;;  %v2581_v37 = vcombine.low %v2571_v33, %v2573_v35 }
 0xc31   :  { %v2588_v10 = vrot.slane %v2580_v36, %v3744_v63  ;;  %v2595_v42 = vrot.slane %v2581_v37, %v3744_v63 }
 0xc33   :  { %v2596_v39 = vcombine.low %v2588_v10, %v2595_v42 }
 0xc35   :  { %v2603_v43 = vrot.slane %v2596_v39, %v3744_v63 }
 0xc37   :  { %v2605_v45 = vadd.f32 %v2603_v43, %v2430_v44 }
 0xc39   :  { %v2606_v22 = vadd.f32 %v2605_v45, %v2343_v30  ;;  %v2614_v46 = vrot.slane %v2605_v45, 1  ;;  %v2624_v50 = vrot.slane %v2605_v45, 2 }
 0xc3b   :  { %v3131_v23 = vmul.f32 -1.442695, %v2606_v22  ;;  %v2616_v47 = vadd.f32 %v2614_v46, %v2345_v31 }
 0xc3d   :  { %3381 = vpow2.f32 %v3131_v23  ;;  %v3132_v48 = vmul.f32 -1.442695, %v2616_v47 }
 0xc3f   :  { %3383 = vpow2.f32 %v3132_v48 }
 0xc4a   :  { %v3382_v49 = vpop.eup %3381 }
 0xc4b   :  { %v2610_v52 = vadd.f32 1.0, %v3382_v49 }
 0xc4c   :  { %v3384_v53 = vpop.eup %3383 }
 0xc4d   :  { %3385 = vrcp.f32 %v2610_v52  ;;  %v2620_v54 = vadd.f32 1.0, %v3384_v53 }
 0xc4e   :  { %3387 = vtanh.f32 %v2624_v50 }
 0xc4f   :  { %3389 = vrcp.f32 %v2620_v54 }
 0xc5a   :  { %v3386_v55 = vpop.eup %3385 }
 0xc5b   :  { %v3388_v8 = vpop.eup %3387 }
 0xc5c   :  { %v3390_v2 = vpop.eup %3389  ;;  %v2627_v38 = vmul.f32 %v3388_v8, %v3386_v55 }
 0xc5d   :  { %v2623_v12 = vmul.f32 %v3390_v2, %v4003_v56  ;;  %v2773_v56 = vrot.slane %v2605_v45, 3 }
 0xc5f   :  { %v4081_v40 = vadd.f32 %v2627_v38, %v2623_v12 }
 0xc61   :  { %3133 = vmatmul.mubr.msk.f32.vlgmr.msra.gmra.mxu0 %vm300_vm2, %v4081_v40  ;;  %3257 = vmatmul.mubr.msk.f32.vlgmr.msra.gmra.mxu1 %vm300_vm2, %v4081_v40 }
 0xc62   :  { %2814 = vmatpush1.msra.mxu0 %v4009_v57  ;;  %2885 = vmatpush1.msra.mxu1 %v4012_v51 }
 0xc63   :  { %2815 = vmatprep.subr.mxu0 %v4015_v59  ;;  %2886 = vmatprep.subr.mxu1 %v4018_v60 }
 0xc64   :  { %2816 = vmatpush1.msra.mxu0 %v4021_v7  ;;  %2887 = vmatpush1.msra.mxu1 %v4024_v61 }
 0xc65   :  { %2817 = vmatprep.subr.mxu0 %v4027_v14  ;;  %2888 = vmatprep.subr.mxu1 %v4030_v62 }
 0xc66   :  { %2818 = vmatpush1.msra.mxu0 %v4033_v1  ;;  %2889 = vmatpush1.msra.mxu1 %v4036_v58 }
 0xc67   :  { %2819 = vmatprep.subr.mxu0 %v4039_v3  ;;  %2890 = vmatprep.subr.mxu1 %v4042_v4 }
 0xc68   :  { %2820 = vmatpush1.msra.mxu0 %v4045_v5  ;;  %2853 = vmatprep.mubr.f32.mxu0 %v3580_v0 }
 0xc69   :  { %2891 = vmatpush1.msra.mxu1 %v4049_v6  ;;  %2924 = vmatprep.mubr.f32.mxu1 %v3580_v0 }
 0xc6a   :  { %3259 = vmatprep.subr.mxu0 %v3580_v0 }
 0xd21   :  { %v2769_v57 = vpop.f32.mrf.mxu1  ;;  %v2698_v58 = vpop.f32.mrf.mxu0 }
 0xd22   :  { %v2775_v51 = vadd.f32 %v2773_v56, %v2769_v57 }
 0xd23   :  { %v3258_v59 = vpop.f32.mrf.mxu1  ;;  %v2700_v3 = vpop.f32.mrf.mxu0 }
 0xd24   :  { %v3135_v60 = vmul.f32 -1.442695, %v2775_v51 }
 0xd26   :  { %3391 = vpow2.f32 %v3135_v60 }
 0xd27   :  { %3393 = vtanh.f32 %v4081_v40 }
 0xd33   :  { %v3392_v7 = vpop.eup %3391 }
 0xd34   :  { %v2779_v61 = vadd.f32 1.0, %v3392_v7  ;;  %v3394_v14 = vpop.eup %3393 }
 0xd36   :  { %3395 = vrcp.f32 %v2779_v61 }
 0xd43   :  { %v3396_v62 = vpop.eup %3395 }
 0xd44   :  { %v2783_v1 = vmul.f32 %v3396_v62, %v3394_v14 }
 0xd46   :  { %3136 = vmatmul.mubr.msk.f32.vlgmr.msra.gmra.mxu0 %vm300_vm2, %v2783_v1  ;;  %3137 = vmatmul.mubr.msk.f32.vlgmr.msra.gmra.mxu1 %vm300_vm2, %v2783_v1 }
 0xd47   :  { %3260 = vmatpush3.msra.mxu0 %v4057_v18  ;;  %3267 = vmatprep.mubr.msk.f32.mxu0 %vm3581_vm1, %v3580_v0  ;;  %v2785_v18 = vld [vmem:[#allocation2 + $0x7] ss:$8 sm:$0xf] }
 0xd48   :  { %3261 = vmatprep.subr.mxu0 %v3580_v0 }
 0xd49   :  { %3262 = vmatpush3.msra.mxu0 %v4061_v21 }
 0xd4a   :  { %3263 = vmatprep.subr.mxu0 %v3580_v0 }
 0xd4b   :  { %3264 = vmatpush3.msra.mxu0 %v4065_v26 }
 0xd4c   :  { %3265 = vmatprep.subr.mxu0 %v3580_v0 }
 0xd4d   :  { %3266 = vmatpush3.msra.mxu0 %v4070_v29 }
 0xe06   :  { %v2855_v4 = vpop.f32.mrf.mxu0  ;;  %v2926_v5 = vpop.f32.mrf.mxu1 }
 0xe08   :  { %v2857_v6 = vpop.f32.mrf.mxu0  ;;  %v2928_v41 = vpop.f32.mrf.mxu1 }
 0xe09   :  { %v2935_v9 = vcombine.low %v2855_v4, %v2857_v6  ;;  %v2936_v11 = vcombine.low %v2926_v5, %v2928_v41 }
 0xe0b   :  { %v2943_v13 = vrot.slane %v2935_v9, %v3744_v63  ;;  %v2950_v15 = vrot.slane %v2936_v11, %v3744_v63 }
 0xe0d   :  { %v2951_v16 = vcombine.low %v2943_v13, %v2950_v15 }
 0xe0f   :  { %v2958_v17 = vrot.slane %v2951_v16, %v3744_v63 }
 0xe11   :  { %v2960_v19 = vadd.f32 %v2958_v17, %v2785_v18 }
 0xe13   :  { %v2961_v0 = vadd.f32 %v2960_v19, %v2698_v58  ;;  %v2969_v20 = vrot.slane %v2960_v19, 1  ;;  %v2979_v27 = vrot.slane %v2960_v19, 2  ;;  %v3057_v36 = vrot.slane %v2960_v19, 3 }
 0xe15   :  { %v3138_v21 = vmul.f32 -1.442695, %v2961_v0  ;;  %v2971_v24 = vadd.f32 %v2969_v20, %v2700_v3 }
 0xe17   :  { %3397 = vpow2.f32 %v3138_v21  ;;  %v3139_v25 = vmul.f32 -1.442695, %v2971_v24 }
 0xe19   :  { %3399 = vpow2.f32 %v3139_v25 }
 0xe24   :  { %v3398_v26 = vpop.eup %3397 }
 0xe25   :  { %v2965_v28 = vadd.f32 1.0, %v3398_v26 }
 0xe26   :  { %v3400_v29 = vpop.eup %3399 }
 0xe27   :  { %3401 = vrcp.f32 %v2965_v28  ;;  %v2975_v30 = vadd.f32 1.0, %v3400_v29 }
 0xe28   :  { %3403 = vtanh.f32 %v2979_v27 }
 0xe29   :  { %3405 = vrcp.f32 %v2975_v30 }
 0xe34   :  { %v3402_v31 = vpop.eup %3401 }
 0xe35   :  { %v3404_v32 = vpop.eup %3403 }
 0xe36   :  { %v3406_v63 = vpop.eup %3405  ;;  %v2982_v34 = vmul.f32 %v3404_v32, %v3402_v31 }
 0xe37   :  { %v2978_v33 = vmul.f32 %v3406_v63, %v4081_v40 }
 0xe39   :  { %v2983_v35 = vadd.f32 %v2982_v34, %v2978_v33 }
 0xe3b   :  { %3268 = vmatmul.mubr.msk.f32.vlgmr.msra.gmra.mxu0 %vm300_vm2, %v2983_v35 }
 0xefb   :  { %v3053_v37 = vpop.f32.mrf.mxu0 }
 0xefc   :  { %v3059_v10 = vadd.f32 %v3057_v36, %v3053_v37 }
 0xefd   :  { %v3269_v42 = vpop.f32.mrf.mxu0 }
 0xefe   :  { %v3141_v39 = vmul.f32 -1.442695, %v3059_v10 }
 0xf00   :  { %3407 = vpow2.f32 %v3141_v39 }
 0xf01   :  { %3409 = vtanh.f32 %v2983_v35 }
 0xf0d   :  { %v3408_v43 = vpop.eup %3407 }
 0xf0e   :  { %v3063_v44 = vadd.f32 1.0, %v3408_v43  ;;  %v3410_v45 = vpop.eup %3409 }
 0xf10   :  { %3411 = vrcp.f32 %v3063_v44 }
 0xf1d   :  { %v3412_v22 = vpop.eup %3411 }
 0xf1e   :  { %v3067_v46 = vmul.f32 %v3412_v22, %v3410_v45 }
 0xf20   :  { %3069 = vst.msk [vmem:[#allocation12] sm:$0x1] %vm3068_vm3, %v3067_v46 }
 0xf21   :  { %3552 = shalt.err (!%p3549_p1)
}
 0xf22   :  { %3079 = dma.vmem_to_hbm [thread:$0]  %s3077_s24, 16, %s4130_s6, [#allocation5]  }
 0xf23   :  { %3567 = dma.done.wait [#allocation5], 16  }
 0xf24   :  { %3568 = vsyncadd [#allocation5], 4294967280 }
 0xf25   :  { %3083 = vsyncpa [#allocation4], 1 }
 0xf26   :  { %3084 = vsyncpa [#allocation7], 1 }
 0xf27   :  { %3085 = vsyncpa [#allocation10], 1 }
 0xf28   :  { %3086 = vsyncpa [#allocation5], 1 }

</bundles_post_ra>
